<compile_context>
chip_gen: v5e
topology: v5e:2x2
jax: 0.10.0
libtpu: 0.0.40
codegen_flags: <defaults>
</compile_context>

<pallas_src>
import math

import jax
import jax.numpy as jnp
from jax import lax
from jax.experimental import pallas as pl
from jax.experimental.pallas import tpu as pltpu

# ----------------------------- config ---------------------------------------
D_MODEL = 32
N_HEADS = 4
HEAD_DIM = D_MODEL // N_HEADS
DFF = 64
NORM_FIRST = True
CAUSAL = True
LN_EPS = 1e-5
NEG_BIG = -1e30                      # finite "masked" score (no inf-inf NaNs)
_SCALE = 1.0 / math.sqrt(HEAD_DIM)

# Weight-slab column offsets (all Linear weights stored (in, out)).
_C_WQKV_S = 0                        # (D, 3D)  fused self-attn q/k/v
_C_WO_S = 3 * D_MODEL                # (D, D)   self-attn out proj
_C_WQ_C = 4 * D_MODEL                # (D, D)   cross-attn q
_C_WKV_C = 5 * D_MODEL               # (D, 2D)  fused cross-attn k/v
_C_WO_C = 7 * D_MODEL                # (D, D)   cross-attn out proj
_C_W1 = 8 * D_MODEL                  # (D, DFF) ffn linear1
_C_W2 = 8 * D_MODEL + DFF            # (DFF, D) ffn linear2
_W_ROWS = max(D_MODEL, DFF)

# Bias / LN-vector slab row indices (each row lane-padded to 3*D_MODEL).
(_R_BQKV_S, _R_BKV_C, _R_BB1, _R_G1, _R_BE1, _R_G2, _R_BE2, _R_G3, _R_BE3,
 _R_BQ_C, _R_BO_S, _R_BO_C, _R_BB2, _NROWS) = range(14)
_VEC_W = 3 * D_MODEL


# ------------------------------- kernel --------------------------------------
def decoder_block_kernel(x_ref, ctx_ref, w_ref, vec_ref, mask_ref, out_ref):
    D = D_MODEL
    rows_q = x_ref.shape[0]          # padded B*S
    rows_kc = ctx_ref.shape[0]       # padded B*S_ctx
    rks = N_HEADS * rows_q           # stacked self-attn key rows
    rkc = N_HEADS * rows_kc          # stacked cross-attn key rows

    x = x_ref[...].astype(jnp.float32)
    ctx = ctx_ref[...].astype(jnp.float32)

    def vec(row, width):             # static (1, width) view of the bias slab
        return vec_ref[row:row + 1, 0:width]

    g1, be1 = vec(_R_G1, D), vec(_R_BE1, D)
    g2, be2 = vec(_R_G2, D), vec(_R_BE2, D)
    g3, be3 = vec(_R_G3, D), vec(_R_BE3, D)
    bqkv_s = vec(_R_BQKV_S, 3 * D)
    bkv_c = vec(_R_BKV_C, 2 * D)
    bq_c = vec(_R_BQ_C, D)
    bo_s = vec(_R_BO_S, D)
    bo_c = vec(_R_BO_C, D)
    bb1 = vec(_R_BB1, DFF)
    bb2 = vec(_R_BB2, D)

    # Precomputed additive masks (block-diagonal head/batch + causal + padding).
    mask_self = mask_ref[:, 0:rks]
    mask_cross = mask_ref[:, rks:rks + rkc]

    def layernorm(h, g, b):
        mu = jnp.mean(h, axis=-1, keepdims=True)
        var = jnp.mean((h - mu) ** 2, axis=-1, keepdims=True)
        return (h - mu) * lax.rsqrt(var + LN_EPS) * g + b

    def stack_heads(t):
        # (R, D) -> (N_HEADS*R, HEAD_DIM): head h occupies rows [h*R, (h+1)*R).
        return jnp.concatenate(
            [t[:, h * HEAD_DIM:(h + 1) * HEAD_DIM] for h in range(N_HEADS)],
            axis=0)

    def unstack_heads(t, rows):
        # (N_HEADS*rows, HEAD_DIM) -> (rows, D)
        return jnp.concatenate(
            [t[h * rows:(h + 1) * rows, :] for h in range(N_HEADS)], axis=1)

    def mha(q, k, v, wo, bo, mask_add):
        rq = q.shape[0]
        qs = stack_heads(q) * _SCALE                     # (H*rq, HD)
        ks = stack_heads(k)                              # (H*rk, HD)
        vs = stack_heads(v)                              # (H*rk, HD)
        # ONE scores matmul for all heads & batch elements (Q @ K^T).
        s = lax.dot_general(qs, ks, (((1,), (1,)), ((), ())),
                            preferred_element_type=jnp.float32)
        s = s + mask_add
        s = s - jnp.max(s, axis=-1, keepdims=True)
        p = jnp.exp(s)
        p = p * pl.reciprocal(jnp.sum(p, axis=-1, keepdims=True), approx=True)
        o = jnp.dot(p, vs, preferred_element_type=jnp.float32)   # (H*rq, HD)
        o = unstack_heads(o, rq)                                  # (rq, D)
        return jnp.dot(o, wo, preferred_element_type=jnp.float32) + bo

    def self_attn(h_in):
        # Fused QKV projection: one (rows, 32) @ (32, 96) matmul.
        qkv = jnp.dot(h_in, w_ref[0:D, _C_WQKV_S:_C_WQKV_S + 3 * D],
                      preferred_element_type=jnp.float32) + bqkv_s
        return mha(qkv[:, 0:D], qkv[:, D:2 * D], qkv[:, 2 * D:3 * D],
                   w_ref[0:D, _C_WO_S:_C_WO_S + D], bo_s, mask_self)

    def cross_attn(h_in):
        q = jnp.dot(h_in, w_ref[0:D, _C_WQ_C:_C_WQ_C + D],
                    preferred_element_type=jnp.float32) + bq_c
        # Fused K/V projection of context: one (rows_kc, 32) @ (32, 64) matmul.
        kv = jnp.dot(ctx, w_ref[0:D, _C_WKV_C:_C_WKV_C + 2 * D],
                     preferred_element_type=jnp.float32) + bkv_c
        return mha(q, kv[:, 0:D], kv[:, D:2 * D],
                   w_ref[0:D, _C_WO_C:_C_WO_C + D], bo_c, mask_cross)

    def ffn(h_in):
        h1 = jnp.dot(h_in, w_ref[0:D, _C_W1:_C_W1 + DFF],
                     preferred_element_type=jnp.float32) + bb1
        h1 = jnp.maximum(h1, 0.0)     # relu
        return jnp.dot(h1, w_ref[0:DFF, _C_W2:_C_W2 + D],
                       preferred_element_type=jnp.float32) + bb2

    if NORM_FIRST:
        x = x + self_attn(layernorm(x, g1, be1))
        x = x + cross_attn(layernorm(x, g2, be2))
        x = x + ffn(layernorm(x, g3, be3))
    else:
        x = layernorm(x + self_attn(x), g1, be1)
        x = layernorm(x + cross_attn(x), g2, be2)
        x = layernorm(x + ffn(x), g3, be3)

    out_ref[...] = x.astype(out_ref.dtype)


# ------------------------------- wrapper --------------------------------------
def _round_up(n, m):
    return ((n + m - 1) // m) * m


def _pad_row(v, width):
    v = v.reshape(1, -1).astype(jnp.float32)
    return jnp.pad(v, ((0, 0), (0, width - v.shape[1])))


def _pack_params(p):
    """Pack every Linear weight / bias / LN vector into two lane-aligned slabs."""
    wqkv_s = jnp.concatenate([p["wq_s"], p["wk_s"], p["wv_s"]], axis=0).T   # (D, 3D)
    wkv_c = jnp.concatenate([p["wk_c"], p["wv_c"]], axis=0).T               # (D, 2D)
    top = jnp.concatenate(
        [wqkv_s, p["wo_s"].T, p["wq_c"].T, wkv_c, p["wo_c"].T, p["w1"].T],
        axis=1)                                                             # (D, 320)
    top = jnp.pad(top, ((0, _W_ROWS - D_MODEL), (0, 0)))
    w2t = jnp.pad(p["w2"].T, ((0, _W_ROWS - DFF), (0, 0)))
    w_slab = jnp.concatenate([top, w2t], axis=1).astype(jnp.float32)        # (64, 352)

    rows = [None] * _NROWS
    rows[_R_BQKV_S] = jnp.concatenate([p["bq_s"], p["bk_s"], p["bv_s"]], axis=1)
    rows[_R_BKV_C] = jnp.concatenate([p["bk_c"], p["bv_c"]], axis=1)
    rows[_R_BB1] = p["bb1"]
    rows[_R_G1], rows[_R_BE1] = p["g1"], p["be1"]
    rows[_R_G2], rows[_R_BE2] = p["g2"], p["be2"]
    rows[_R_G3], rows[_R_BE3] = p["g3"], p["be3"]
    rows[_R_BQ_C], rows[_R_BO_S] = p["bq_c"], p["bo_s"]
    rows[_R_BO_C], rows[_R_BB2] = p["bo_c"], p["bb2"]
    vec_slab = jnp.concatenate([_pad_row(r, _VEC_W) for r in rows], axis=0)  # (13, 96)
    return w_slab, vec_slab


def _build_masks(B, S, S_ctx, rows_q, rows_kc):
    """Additive masks for stacked-heads attention, packed into one (RQ, .) slab.

    Stacked row index = h * rows + (b * seq + pos). Invalid positions (other
    head, other batch element, acausal, or row padding) get NEG_BIG.
    """
    def make(rows_k, s_k, causal):
        i = jnp.arange(N_HEADS * rows_q)[:, None]
        j = jnp.arange(N_HEADS * rows_k)[None, :]
        hq, rq = i // rows_q, i % rows_q
        hk, rk = j // rows_k, j % rows_k
        bq, pq = rq // S, rq % S
        bk, pk = rk // s_k, rk % s_k
        valid = (hq == hk) & (bq == bk) & (rq < B * S) & (rk < B * s_k)
        if causal:
            valid = valid & (pk <= pq)
        return jnp.where(valid, 0.0, NEG_BIG).astype(jnp.float32)

    m_self = make(rows_q, S, CAUSAL)
    m_cross = make(rows_kc, S_ctx, False)
    return jnp.concatenate([m_self, m_cross], axis=1)


def decoder_block(x, context, params):
    B, S, D = x.shape
    _, S_ctx, _ = context.shape
    assert D == D_MODEL
    bs, bc = B * S, B * S_ctx
    bs_pad, bc_pad = _round_up(bs, 8), _round_up(bc, 8)

    x2 = jnp.pad(x.reshape(bs, D), ((0, bs_pad - bs), (0, 0)))
    c2 = jnp.pad(context.reshape(bc, D), ((0, bc_pad - bc), (0, 0)))

    w_slab, vec_slab = _pack_params(params)
    mask_slab = _build_masks(B, S, S_ctx, bs_pad, bc_pad)

    def full(arr):
        return pl.BlockSpec(arr.shape, lambda i, _nd=arr.ndim: (0,) * _nd)

    out = pl.pallas_call(
        decoder_block_kernel,
        out_shape=jax.ShapeDtypeStruct((bs_pad, D), x.dtype),
        grid_spec=pltpu.PrefetchScalarGridSpec(
            num_scalar_prefetch=0,
            grid=(1,),                       # whole batch in a single step
            in_specs=[full(x2), full(c2), full(w_slab), full(vec_slab),
                      full(mask_slab)],
            out_specs=pl.BlockSpec((bs_pad, D), lambda i: (0, 0)),
        ),
        compiler_params=pltpu.CompilerParams(
            dimension_semantics=("arbitrary",)),
    )(x2, c2, w_slab, vec_slab, mask_slab)
    return out[:bs].reshape(B, S, D)


# ------------------------- pure-JAX reference ---------------------------------
def _ref_mha(q_in, kv_in, wq, wk, wv, bq, bk, bv, wo, bo, causal):
    q = q_in @ wq.T + bq
    k = kv_in @ wk.T + bk
    v = kv_in @ wv.T + bv
    B, Sq, _ = q.shape
    Sk = k.shape[1]
    qh = q.reshape(B, Sq, N_HEADS, HEAD_DIM).transpose(0, 2, 1, 3)
    kh = k.reshape(B, Sk, N_HEADS, HEAD_DIM).transpose(0, 2, 1, 3)
    vh = v.reshape(B, Sk, N_HEADS, HEAD_DIM).transpose(0, 2, 1, 3)
    scores = jnp.einsum("bhqd,bhkd->bhqk", qh, kh) / math.sqrt(HEAD_DIM)
    if causal:
        mask = jnp.triu(jnp.ones((Sq, Sk), bool), k=1)
        scores = jnp.where(mask, -jnp.inf, scores)
    probs = jax.nn.softmax(scores, axis=-1)
    out = jnp.einsum("bhqk,bhkd->bhqd", probs, vh)
    out = out.transpose(0, 2, 1, 3).reshape(B, Sq, D_MODEL)
    return out @ wo.T + bo


def decoder_block_ref(x, ctx, p):
    def ln(h, g, b):
        mu = jnp.mean(h, -1, keepdims=True)
        var = jnp.mean((h - mu) ** 2, -1, keepdims=True)
        return (h - mu) * lax.rsqrt(var + LN_EPS) * g + b

    def ffn(h):
        h1 = jnp.maximum(h @ p["w1"].T + p["bb1"], 0.0)
        return h1 @ p["w2"].T + p["bb2"]

    x = x + _ref_mha(ln(x, p["g1"], p["be1"]), ln(x, p["g1"], p["be1"]),
                     p["wq_s"], p["wk_s"], p["wv_s"], p["bq_s"], p["bk_s"],
                     p["bv_s"], p["wo_s"], p["bo_s"], causal=CAUSAL)
    x = x + _ref_mha(ln(x, p["g2"], p["be2"]), ctx,
                     p["wq_c"], p["wk_c"], p["wv_c"], p["bq_c"], p["bk_c"],
                     p["bv_c"], p["wo_c"], p["bo_c"], causal=False)
    x = x + ffn(ln(x, p["g3"], p["be3"]))
    return x


# --------------------------------- main ---------------------------------------
def _init_params(key):
    ks = jax.random.split(key, 16)
    n = lambda k, shape, s=0.05: (jax.random.normal(k, shape) * s).astype(jnp.float32)
    p = {}
    # layernorms
    p["g1"] = jnp.ones((1, D_MODEL), jnp.float32); p["be1"] = jnp.zeros((1, D_MODEL), jnp.float32)
    p["g2"] = jnp.ones((1, D_MODEL), jnp.float32); p["be2"] = jnp.zeros((1, D_MODEL), jnp.float32)
    p["g3"] = jnp.ones((1, D_MODEL), jnp.float32); p["be3"] = jnp.zeros((1, D_MODEL), jnp.float32)
    # self-attention (split of in_proj_weight / in_proj_bias + out_proj)
    p["wq_s"] = n(ks[0], (D_MODEL, D_MODEL)); p["wk_s"] = n(ks[1], (D_MODEL, D_MODEL))
    p["wv_s"] = n(ks[2], (D_MODEL, D_MODEL))
    p["bq_s"] = n(ks[3], (1, D_MODEL)); p["bk_s"] = n(ks[4], (1, D_MODEL)); p["bv_s"] = n(ks[5], (1, D_MODEL))
    p["wo_s"] = n(ks[6], (D_MODEL, D_MODEL)); p["bo_s"] = n(ks[7], (1, D_MODEL))
    # cross-attention
    p["wq_c"] = n(ks[8], (D_MODEL, D_MODEL)); p["wk_c"] = n(ks[9], (D_MODEL, D_MODEL))
    p["wv_c"] = n(ks[10], (D_MODEL, D_MODEL))
    p["bq_c"] = n(ks[11], (1, D_MODEL)); p["bk_c"] = n(ks[12], (1, D_MODEL)); p["bv_c"] = n(ks[13], (1, D_MODEL))
    p["wo_c"] = n(ks[14], (D_MODEL, D_MODEL)); p["bo_c"] = n(ks[15], (1, D_MODEL))
    # feed-forward (use_bias=True, activation=relu)
    kf = jax.random.split(jax.random.fold_in(key, 7), 4)
    p["w1"] = n(kf[0], (DFF, D_MODEL)); p["bb1"] = n(kf[1], (1, DFF))
    p["w2"] = n(kf[2], (D_MODEL, DFF)); p["bb2"] = n(kf[3], (1, D_MODEL))
    return p


if __name__ == "__main__":
    key = jax.random.PRNGKey(0)
    kx, kc, kp = jax.random.split(key, 3)

    B, S, S_CTX = 2, 8, 10
    x = jax.random.normal(kx, (B, S, D_MODEL), jnp.float32)
    context = jax.random.normal(kc, (B, S_CTX, D_MODEL), jnp.float32)
    params = _init_params(kp)

    out = decoder_block(x, context, params)
    out = jax.block_until_ready(out)

    ref = decoder_block_ref(x, context, params)
    assert out.shape == (B, S, D_MODEL)
    # slightly looser tolerance because the softmax uses the EUP approx reciprocal
    assert jnp.allclose(out, ref, atol=2e-3, rtol=2e-3), "mismatch vs JAX reference"

    print("KERNEL_OK")
</pallas_src>

<mosaic_0001>
module attributes {stable_mosaic.version = 11 : i64} {
  func.func @decoder_block_kernel(%arg0: i32, %arg1: memref<16x32xf32, #tpu.memory_space<vmem>>, %arg2: memref<24x32xf32, #tpu.memory_space<vmem>>, %arg3: memref<64x352xf32, #tpu.memory_space<vmem>>, %arg4: memref<13x96xf32, #tpu.memory_space<vmem>>, %arg5: memref<64x160xf32, #tpu.memory_space<vmem>>, %arg6: memref<16x32xf32, #tpu.memory_space<vmem>>) attributes {dimension_semantics = [#tpu.dimension_semantics<arbitrary>], iteration_bounds = array<i64: 1>, scalar_prefetch = 0 : i64, scratch_operands = 0 : i64, tpu.core_type = #tpu.core_type<tc>, window_params = [{pipeline_mode = #tpu.pipeline_mode<synchronous>, transform_indices = @transform_0, window_bounds = array<i64: 16, 32>}, {pipeline_mode = #tpu.pipeline_mode<synchronous>, transform_indices = @transform_1, window_bounds = array<i64: 24, 32>}, {pipeline_mode = #tpu.pipeline_mode<synchronous>, transform_indices = @transform_2, window_bounds = array<i64: 64, 352>}, {pipeline_mode = #tpu.pipeline_mode<synchronous>, transform_indices = @transform_3, window_bounds = array<i64: 13, 96>}, {pipeline_mode = #tpu.pipeline_mode<synchronous>, transform_indices = @transform_4, window_bounds = array<i64: 64, 160>}, {pipeline_mode = #tpu.pipeline_mode<synchronous>, transform_indices = @transform_5, window_bounds = array<i64: 16, 32>}]} {
    %c0 = arith.constant 0 : index
    %c0_0 = arith.constant 0 : index
    %0 = vector.load %arg1[%c0, %c0_0] : memref<16x32xf32, #tpu.memory_space<vmem>>, vector<16x32xf32>
    %c0_1 = arith.constant 0 : index
    %c0_2 = arith.constant 0 : index
    %1 = vector.load %arg2[%c0_1, %c0_2] : memref<24x32xf32, #tpu.memory_space<vmem>>, vector<24x32xf32>
    %c3 = arith.constant 3 : index
    %c0_3 = arith.constant 0 : index
    %2 = vector.load %arg4[%c3, %c0_3] : memref<13x96xf32, #tpu.memory_space<vmem>>, vector<1x32xf32>
    %c4 = arith.constant 4 : index
    %c0_4 = arith.constant 0 : index
    %3 = vector.load %arg4[%c4, %c0_4] : memref<13x96xf32, #tpu.memory_space<vmem>>, vector<1x32xf32>
    %c5 = arith.constant 5 : index
    %c0_5 = arith.constant 0 : index
    %4 = vector.load %arg4[%c5, %c0_5] : memref<13x96xf32, #tpu.memory_space<vmem>>, vector<1x32xf32>
    %c6 = arith.constant 6 : index
    %c0_6 = arith.constant 0 : index
    %5 = vector.load %arg4[%c6, %c0_6] : memref<13x96xf32, #tpu.memory_space<vmem>>, vector<1x32xf32>
    %c7 = arith.constant 7 : index
    %c0_7 = arith.constant 0 : index
    %6 = vector.load %arg4[%c7, %c0_7] : memref<13x96xf32, #tpu.memory_space<vmem>>, vector<1x32xf32>
    %c8 = arith.constant 8 : index
    %c0_8 = arith.constant 0 : index
    %7 = vector.load %arg4[%c8, %c0_8] : memref<13x96xf32, #tpu.memory_space<vmem>>, vector<1x32xf32>
    %c0_9 = arith.constant 0 : index
    %c0_10 = arith.constant 0 : index
    %8 = vector.load %arg4[%c0_9, %c0_10] : memref<13x96xf32, #tpu.memory_space<vmem>>, vector<1x96xf32>
    %c1 = arith.constant 1 : index
    %c0_11 = arith.constant 0 : index
    %9 = vector.load %arg4[%c1, %c0_11] : memref<13x96xf32, #tpu.memory_space<vmem>>, vector<1x64xf32>
    %c9 = arith.constant 9 : index
    %c0_12 = arith.constant 0 : index
    %10 = vector.load %arg4[%c9, %c0_12] : memref<13x96xf32, #tpu.memory_space<vmem>>, vector<1x32xf32>
    %c10 = arith.constant 10 : index
    %c0_13 = arith.constant 0 : index
    %11 = vector.load %arg4[%c10, %c0_13] : memref<13x96xf32, #tpu.memory_space<vmem>>, vector<1x32xf32>
    %c11 = arith.constant 11 : index
    %c0_14 = arith.constant 0 : index
    %12 = vector.load %arg4[%c11, %c0_14] : memref<13x96xf32, #tpu.memory_space<vmem>>, vector<1x32xf32>
    %c2 = arith.constant 2 : index
    %c0_15 = arith.constant 0 : index
    %13 = vector.load %arg4[%c2, %c0_15] : memref<13x96xf32, #tpu.memory_space<vmem>>, vector<1x64xf32>
    %c12 = arith.constant 12 : index
    %c0_16 = arith.constant 0 : index
    %14 = vector.load %arg4[%c12, %c0_16] : memref<13x96xf32, #tpu.memory_space<vmem>>, vector<1x32xf32>
    %c0_17 = arith.constant 0 : index
    %c0_18 = arith.constant 0 : index
    %15 = vector.load %arg5[%c0_17, %c0_18] : memref<64x160xf32, #tpu.memory_space<vmem>>, vector<64x64xf32>
    %c0_19 = arith.constant 0 : index
    %c64 = arith.constant 64 : index
    %16 = vector.load %arg5[%c0_19, %c64] : memref<64x160xf32, #tpu.memory_space<vmem>>, vector<64x96xf32>
    %cst = arith.constant dense<0.000000e+00> : vector<16xf32>
    %17 = vector.multi_reduction <add>, %0, %cst [1] : vector<16x32xf32> to vector<16xf32>
    %18 = vector.shape_cast %17 : vector<16xf32> to vector<16x1xf32>
    %cst_20 = arith.constant 3.200000e+01 : f32
    %19 = vector.broadcast %cst_20 : f32 to vector<16x1xf32>
    %20 = arith.divf %18, %19 : vector<16x1xf32>
    %21 = vector.broadcast %20 : vector<16x1xf32> to vector<16x32xf32>
    %22 = arith.subf %0, %21 : vector<16x32xf32>
    %23 = arith.mulf %22, %22 : vector<16x32xf32>
    %cst_21 = arith.constant dense<0.000000e+00> : vector<16xf32>
    %24 = vector.multi_reduction <add>, %23, %cst_21 [1] : vector<16x32xf32> to vector<16xf32>
    %25 = vector.shape_cast %24 : vector<16xf32> to vector<16x1xf32>
    %cst_22 = arith.constant 3.200000e+01 : f32
    %26 = vector.broadcast %cst_22 : f32 to vector<16x1xf32>
    %27 = arith.divf %25, %26 : vector<16x1xf32>
    %28 = vector.broadcast %20 : vector<16x1xf32> to vector<16x32xf32>
    %29 = arith.subf %0, %28 : vector<16x32xf32>
    %cst_23 = arith.constant 9.99999974E-6 : f32
    %30 = vector.broadcast %cst_23 : f32 to vector<16x1xf32>
    %31 = arith.addf %27, %30 : vector<16x1xf32>
    %32 = math.rsqrt %31 : vector<16x1xf32>
    %33 = vector.broadcast %32 : vector<16x1xf32> to vector<16x32xf32>
    %34 = arith.mulf %29, %33 : vector<16x32xf32>
    %35 = vector.broadcast %2 : vector<1x32xf32> to vector<16x32xf32>
    %36 = arith.mulf %34, %35 : vector<16x32xf32>
    %37 = vector.broadcast %3 : vector<1x32xf32> to vector<16x32xf32>
    %38 = arith.addf %36, %37 : vector<16x32xf32>
    %c0_24 = arith.constant 0 : index
    %c0_25 = arith.constant 0 : index
    %39 = vector.load %arg3[%c0_24, %c0_25] : memref<64x352xf32, #tpu.memory_space<vmem>>, vector<32x96xf32>
    %cst_26 = arith.constant dense<0.000000e+00> : vector<16x96xf32>
    %40 = tpu.matmul %38, %39, %cst_26 {dimension_numbers = #tpu.dot_dimension_numbers<[1], [0], [0], [1], [0, 0, 1, 1], [], []>} : vector<16x32xf32>, vector<32x96xf32>, vector<16x96xf32> -> vector<16x96xf32>
    %41 = vector.broadcast %8 : vector<1x96xf32> to vector<16x96xf32>
    %42 = arith.addf %40, %41 : vector<16x96xf32>
    %43 = vector.extract_strided_slice %42 {offsets = [0, 0], sizes = [16, 32], strides = [1, 1]} : vector<16x96xf32> to vector<16x32xf32>
    %44 = vector.extract_strided_slice %42 {offsets = [0, 32], sizes = [16, 32], strides = [1, 1]} : vector<16x96xf32> to vector<16x32xf32>
    %45 = vector.extract_strided_slice %42 {offsets = [0, 64], sizes = [16, 32], strides = [1, 1]} : vector<16x96xf32> to vector<16x32xf32>
    %c0_27 = arith.constant 0 : index
    %c96 = arith.constant 96 : index
    %46 = vector.load %arg3[%c0_27, %c96] : memref<64x352xf32, #tpu.memory_space<vmem>>, vector<32x32xf32>
    %47 = vector.extract_strided_slice %43 {offsets = [0, 0], sizes = [16, 8], strides = [1, 1]} : vector<16x32xf32> to vector<16x8xf32>
    %48 = vector.extract_strided_slice %43 {offsets = [0, 8], sizes = [16, 8], strides = [1, 1]} : vector<16x32xf32> to vector<16x8xf32>
    %49 = vector.extract_strided_slice %43 {offsets = [0, 16], sizes = [16, 8], strides = [1, 1]} : vector<16x32xf32> to vector<16x8xf32>
    %50 = vector.extract_strided_slice %43 {offsets = [0, 24], sizes = [16, 8], strides = [1, 1]} : vector<16x32xf32> to vector<16x8xf32>
    %51 = tpu.concatenate %47, %48, %49, %50 in 0 : vector<16x8xf32>, vector<16x8xf32>, vector<16x8xf32>, vector<16x8xf32> -> vector<64x8xf32>
    %cst_28 = arith.constant 0.353553385 : f32
    %52 = vector.broadcast %cst_28 : f32 to vector<64x8xf32>
    %53 = arith.mulf %51, %52 : vector<64x8xf32>
    %54 = vector.extract_strided_slice %44 {offsets = [0, 0], sizes = [16, 8], strides = [1, 1]} : vector<16x32xf32> to vector<16x8xf32>
    %55 = vector.extract_strided_slice %44 {offsets = [0, 8], sizes = [16, 8], strides = [1, 1]} : vector<16x32xf32> to vector<16x8xf32>
    %56 = vector.extract_strided_slice %44 {offsets = [0, 16], sizes = [16, 8], strides = [1, 1]} : vector<16x32xf32> to vector<16x8xf32>
    %57 = vector.extract_strided_slice %44 {offsets = [0, 24], sizes = [16, 8], strides = [1, 1]} : vector<16x32xf32> to vector<16x8xf32>
    %58 = tpu.concatenate %54, %55, %56, %57 in 0 : vector<16x8xf32>, vector<16x8xf32>, vector<16x8xf32>, vector<16x8xf32> -> vector<64x8xf32>
    %59 = vector.extract_strided_slice %45 {offsets = [0, 0], sizes = [16, 8], strides = [1, 1]} : vector<16x32xf32> to vector<16x8xf32>
    %60 = vector.extract_strided_slice %45 {offsets = [0, 8], sizes = [16, 8], strides = [1, 1]} : vector<16x32xf32> to vector<16x8xf32>
    %61 = vector.extract_strided_slice %45 {offsets = [0, 16], sizes = [16, 8], strides = [1, 1]} : vector<16x32xf32> to vector<16x8xf32>
    %62 = vector.extract_strided_slice %45 {offsets = [0, 24], sizes = [16, 8], strides = [1, 1]} : vector<16x32xf32> to vector<16x8xf32>
    %63 = tpu.concatenate %59, %60, %61, %62 in 0 : vector<16x8xf32>, vector<16x8xf32>, vector<16x8xf32>, vector<16x8xf32> -> vector<64x8xf32>
    %cst_29 = arith.constant dense<0.000000e+00> : vector<64x64xf32>
    %64 = tpu.matmul %53, %58, %cst_29 {dimension_numbers = #tpu.dot_dimension_numbers<[1], [1], [0], [0], [0, 0, 1, 0], [], []>} : vector<64x8xf32>, vector<64x8xf32>, vector<64x64xf32> -> vector<64x64xf32>
    %65 = arith.addf %64, %15 : vector<64x64xf32>
    %cst_30 = arith.constant dense<0xFF800000> : vector<64xf32>
    %66 = vector.multi_reduction <maximumf>, %65, %cst_30 [1] : vector<64x64xf32> to vector<64xf32>
    %67 = vector.shape_cast %66 : vector<64xf32> to vector<64x1xf32>
    %68 = vector.broadcast %67 : vector<64x1xf32> to vector<64x64xf32>
    %69 = arith.subf %65, %68 : vector<64x64xf32>
    %70 = math.exp %69 : vector<64x64xf32>
    %cst_31 = arith.constant dense<0.000000e+00> : vector<64xf32>
    %71 = vector.multi_reduction <add>, %70, %cst_31 [1] : vector<64x64xf32> to vector<64xf32>
    %72 = vector.shape_cast %71 : vector<64xf32> to vector<64x1xf32>
    %73 = tpu.reciprocal %72 {approx = true} : vector<64x1xf32> -> vector<64x1xf32>
    %74 = vector.broadcast %73 : vector<64x1xf32> to vector<64x64xf32>
    %75 = arith.mulf %70, %74 : vector<64x64xf32>
    %cst_32 = arith.constant dense<0.000000e+00> : vector<64x8xf32>
    %76 = tpu.matmul %75, %63, %cst_32 {dimension_numbers = #tpu.dot_dimension_numbers<[1], [0], [0], [1], [0, 0, 1, 1], [], []>} : vector<64x64xf32>, vector<64x8xf32>, vector<64x8xf32> -> vector<64x8xf32>
    %77 = vector.extract_strided_slice %76 {offsets = [0, 0], sizes = [16, 8], strides = [1, 1]} : vector<64x8xf32> to vector<16x8xf32>
    %78 = vector.extract_strided_slice %76 {offsets = [16, 0], sizes = [16, 8], strides = [1, 1]} : vector<64x8xf32> to vector<16x8xf32>
    %79 = vector.extract_strided_slice %76 {offsets = [32, 0], sizes = [16, 8], strides = [1, 1]} : vector<64x8xf32> to vector<16x8xf32>
    %80 = vector.extract_strided_slice %76 {offsets = [48, 0], sizes = [16, 8], strides = [1, 1]} : vector<64x8xf32> to vector<16x8xf32>
    %81 = tpu.concatenate %77, %78, %79, %80 in 1 : vector<16x8xf32>, vector<16x8xf32>, vector<16x8xf32>, vector<16x8xf32> -> vector<16x32xf32>
    %cst_33 = arith.constant dense<0.000000e+00> : vector<16x32xf32>
    %82 = tpu.matmul %81, %46, %cst_33 {dimension_numbers = #tpu.dot_dimension_numbers<[1], [0], [0], [1], [0, 0, 1, 1], [], []>} : vector<16x32xf32>, vector<32x32xf32>, vector<16x32xf32> -> vector<16x32xf32>
    %83 = vector.broadcast %11 : vector<1x32xf32> to vector<16x32xf32>
    %84 = arith.addf %82, %83 : vector<16x32xf32>
    %85 = arith.addf %0, %84 : vector<16x32xf32>
    %cst_34 = arith.constant dense<0.000000e+00> : vector<16xf32>
    %86 = vector.multi_reduction <add>, %85, %cst_34 [1] : vector<16x32xf32> to vector<16xf32>
    %87 = vector.shape_cast %86 : vector<16xf32> to vector<16x1xf32>
    %cst_35 = arith.constant 3.200000e+01 : f32
    %88 = vector.broadcast %cst_35 : f32 to vector<16x1xf32>
    %89 = arith.divf %87, %88 : vector<16x1xf32>
    %90 = vector.broadcast %89 : vector<16x1xf32> to vector<16x32xf32>
    %91 = arith.subf %85, %90 : vector<16x32xf32>
    %92 = arith.mulf %91, %91 : vector<16x32xf32>
    %cst_36 = arith.constant dense<0.000000e+00> : vector<16xf32>
    %93 = vector.multi_reduction <add>, %92, %cst_36 [1] : vector<16x32xf32> to vector<16xf32>
    %94 = vector.shape_cast %93 : vector<16xf32> to vector<16x1xf32>
    %cst_37 = arith.constant 3.200000e+01 : f32
    %95 = vector.broadcast %cst_37 : f32 to vector<16x1xf32>
    %96 = arith.divf %94, %95 : vector<16x1xf32>
    %97 = vector.broadcast %89 : vector<16x1xf32> to vector<16x32xf32>
    %98 = arith.subf %85, %97 : vector<16x32xf32>
    %cst_38 = arith.constant 9.99999974E-6 : f32
    %99 = vector.broadcast %cst_38 : f32 to vector<16x1xf32>
    %100 = arith.addf %96, %99 : vector<16x1xf32>
    %101 = math.rsqrt %100 : vector<16x1xf32>
    %102 = vector.broadcast %101 : vector<16x1xf32> to vector<16x32xf32>
    %103 = arith.mulf %98, %102 : vector<16x32xf32>
    %104 = vector.broadcast %4 : vector<1x32xf32> to vector<16x32xf32>
    %105 = arith.mulf %103, %104 : vector<16x32xf32>
    %106 = vector.broadcast %5 : vector<1x32xf32> to vector<16x32xf32>
    %107 = arith.addf %105, %106 : vector<16x32xf32>
    %c0_39 = arith.constant 0 : index
    %c128 = arith.constant 128 : index
    %108 = vector.load %arg3[%c0_39, %c128] : memref<64x352xf32, #tpu.memory_space<vmem>>, vector<32x32xf32>
    %cst_40 = arith.constant dense<0.000000e+00> : vector<16x32xf32>
    %109 = tpu.matmul %107, %108, %cst_40 {dimension_numbers = #tpu.dot_dimension_numbers<[1], [0], [0], [1], [0, 0, 1, 1], [], []>} : vector<16x32xf32>, vector<32x32xf32>, vector<16x32xf32> -> vector<16x32xf32>
    %110 = vector.broadcast %10 : vector<1x32xf32> to vector<16x32xf32>
    %111 = arith.addf %109, %110 : vector<16x32xf32>
    %c0_41 = arith.constant 0 : index
    %c160 = arith.constant 160 : index
    %112 = vector.load %arg3[%c0_41, %c160] : memref<64x352xf32, #tpu.memory_space<vmem>>, vector<32x64xf32>
    %cst_42 = arith.constant dense<0.000000e+00> : vector<24x64xf32>
    %113 = tpu.matmul %1, %112, %cst_42 {dimension_numbers = #tpu.dot_dimension_numbers<[1], [0], [0], [1], [0, 0, 1, 1], [], []>} : vector<24x32xf32>, vector<32x64xf32>, vector<24x64xf32> -> vector<24x64xf32>
    %114 = vector.broadcast %9 : vector<1x64xf32> to vector<24x64xf32>
    %115 = arith.addf %113, %114 : vector<24x64xf32>
    %116 = vector.extract_strided_slice %115 {offsets = [0, 0], sizes = [24, 32], strides = [1, 1]} : vector<24x64xf32> to vector<24x32xf32>
    %117 = vector.extract_strided_slice %115 {offsets = [0, 32], sizes = [24, 32], strides = [1, 1]} : vector<24x64xf32> to vector<24x32xf32>
    %c0_43 = arith.constant 0 : index
    %c224 = arith.constant 224 : index
    %118 = vector.load %arg3[%c0_43, %c224] : memref<64x352xf32, #tpu.memory_space<vmem>>, vector<32x32xf32>
    %119 = vector.extract_strided_slice %111 {offsets = [0, 0], sizes = [16, 8], strides = [1, 1]} : vector<16x32xf32> to vector<16x8xf32>
    %120 = vector.extract_strided_slice %111 {offsets = [0, 8], sizes = [16, 8], strides = [1, 1]} : vector<16x32xf32> to vector<16x8xf32>
    %121 = vector.extract_strided_slice %111 {offsets = [0, 16], sizes = [16, 8], strides = [1, 1]} : vector<16x32xf32> to vector<16x8xf32>
    %122 = vector.extract_strided_slice %111 {offsets = [0, 24], sizes = [16, 8], strides = [1, 1]} : vector<16x32xf32> to vector<16x8xf32>
    %123 = tpu.concatenate %119, %120, %121, %122 in 0 : vector<16x8xf32>, vector<16x8xf32>, vector<16x8xf32>, vector<16x8xf32> -> vector<64x8xf32>
    %cst_44 = arith.constant 0.353553385 : f32
    %124 = vector.broadcast %cst_44 : f32 to vector<64x8xf32>
    %125 = arith.mulf %123, %124 : vector<64x8xf32>
    %126 = vector.extract_strided_slice %116 {offsets = [0, 0], sizes = [24, 8], strides = [1, 1]} : vector<24x32xf32> to vector<24x8xf32>
    %127 = vector.extract_strided_slice %116 {offsets = [0, 8], sizes = [24, 8], strides = [1, 1]} : vector<24x32xf32> to vector<24x8xf32>
    %128 = vector.extract_strided_slice %116 {offsets = [0, 16], sizes = [24, 8], strides = [1, 1]} : vector<24x32xf32> to vector<24x8xf32>
    %129 = vector.extract_strided_slice %116 {offsets = [0, 24], sizes = [24, 8], strides = [1, 1]} : vector<24x32xf32> to vector<24x8xf32>
    %130 = tpu.concatenate %126, %127, %128, %129 in 0 : vector<24x8xf32>, vector<24x8xf32>, vector<24x8xf32>, vector<24x8xf32> -> vector<96x8xf32>
    %131 = vector.extract_strided_slice %117 {offsets = [0, 0], sizes = [24, 8], strides = [1, 1]} : vector<24x32xf32> to vector<24x8xf32>
    %132 = vector.extract_strided_slice %117 {offsets = [0, 8], sizes = [24, 8], strides = [1, 1]} : vector<24x32xf32> to vector<24x8xf32>
    %133 = vector.extract_strided_slice %117 {offsets = [0, 16], sizes = [24, 8], strides = [1, 1]} : vector<24x32xf32> to vector<24x8xf32>
    %134 = vector.extract_strided_slice %117 {offsets = [0, 24], sizes = [24, 8], strides = [1, 1]} : vector<24x32xf32> to vector<24x8xf32>
    %135 = tpu.concatenate %131, %132, %133, %134 in 0 : vector<24x8xf32>, vector<24x8xf32>, vector<24x8xf32>, vector<24x8xf32> -> vector<96x8xf32>
    %cst_45 = arith.constant dense<0.000000e+00> : vector<64x96xf32>
    %136 = tpu.matmul %125, %130, %cst_45 {dimension_numbers = #tpu.dot_dimension_numbers<[1], [1], [0], [0], [0, 0, 1, 0], [], []>} : vector<64x8xf32>, vector<96x8xf32>, vector<64x96xf32> -> vector<64x96xf32>
    %137 = arith.addf %136, %16 : vector<64x96xf32>
    %cst_46 = arith.constant dense<0xFF800000> : vector<64xf32>
    %138 = vector.multi_reduction <maximumf>, %137, %cst_46 [1] : vector<64x96xf32> to vector<64xf32>
    %139 = vector.shape_cast %138 : vector<64xf32> to vector<64x1xf32>
    %140 = vector.broadcast %139 : vector<64x1xf32> to vector<64x96xf32>
    %141 = arith.subf %137, %140 : vector<64x96xf32>
    %142 = math.exp %141 : vector<64x96xf32>
    %cst_47 = arith.constant dense<0.000000e+00> : vector<64xf32>
    %143 = vector.multi_reduction <add>, %142, %cst_47 [1] : vector<64x96xf32> to vector<64xf32>
    %144 = vector.shape_cast %143 : vector<64xf32> to vector<64x1xf32>
    %145 = tpu.reciprocal %144 {approx = true} : vector<64x1xf32> -> vector<64x1xf32>
    %146 = vector.broadcast %145 : vector<64x1xf32> to vector<64x96xf32>
    %147 = arith.mulf %142, %146 : vector<64x96xf32>
    %cst_48 = arith.constant dense<0.000000e+00> : vector<64x8xf32>
    %148 = tpu.matmul %147, %135, %cst_48 {dimension_numbers = #tpu.dot_dimension_numbers<[1], [0], [0], [1], [0, 0, 1, 1], [], []>} : vector<64x96xf32>, vector<96x8xf32>, vector<64x8xf32> -> vector<64x8xf32>
    %149 = vector.extract_strided_slice %148 {offsets = [0, 0], sizes = [16, 8], strides = [1, 1]} : vector<64x8xf32> to vector<16x8xf32>
    %150 = vector.extract_strided_slice %148 {offsets = [16, 0], sizes = [16, 8], strides = [1, 1]} : vector<64x8xf32> to vector<16x8xf32>
    %151 = vector.extract_strided_slice %148 {offsets = [32, 0], sizes = [16, 8], strides = [1, 1]} : vector<64x8xf32> to vector<16x8xf32>
    %152 = vector.extract_strided_slice %148 {offsets = [48, 0], sizes = [16, 8], strides = [1, 1]} : vector<64x8xf32> to vector<16x8xf32>
    %153 = tpu.concatenate %149, %150, %151, %152 in 1 : vector<16x8xf32>, vector<16x8xf32>, vector<16x8xf32>, vector<16x8xf32> -> vector<16x32xf32>
    %cst_49 = arith.constant dense<0.000000e+00> : vector<16x32xf32>
    %154 = tpu.matmul %153, %118, %cst_49 {dimension_numbers = #tpu.dot_dimension_numbers<[1], [0], [0], [1], [0, 0, 1, 1], [], []>} : vector<16x32xf32>, vector<32x32xf32>, vector<16x32xf32> -> vector<16x32xf32>
    %155 = vector.broadcast %12 : vector<1x32xf32> to vector<16x32xf32>
    %156 = arith.addf %154, %155 : vector<16x32xf32>
    %157 = arith.addf %85, %156 : vector<16x32xf32>
    %cst_50 = arith.constant dense<0.000000e+00> : vector<16xf32>
    %158 = vector.multi_reduction <add>, %157, %cst_50 [1] : vector<16x32xf32> to vector<16xf32>
    %159 = vector.shape_cast %158 : vector<16xf32> to vector<16x1xf32>
    %cst_51 = arith.constant 3.200000e+01 : f32
    %160 = vector.broadcast %cst_51 : f32 to vector<16x1xf32>
    %161 = arith.divf %159, %160 : vector<16x1xf32>
    %162 = vector.broadcast %161 : vector<16x1xf32> to vector<16x32xf32>
    %163 = arith.subf %157, %162 : vector<16x32xf32>
    %164 = arith.mulf %163, %163 : vector<16x32xf32>
    %cst_52 = arith.constant dense<0.000000e+00> : vector<16xf32>
    %165 = vector.multi_reduction <add>, %164, %cst_52 [1] : vector<16x32xf32> to vector<16xf32>
    %166 = vector.shape_cast %165 : vector<16xf32> to vector<16x1xf32>
    %cst_53 = arith.constant 3.200000e+01 : f32
    %167 = vector.broadcast %cst_53 : f32 to vector<16x1xf32>
    %168 = arith.divf %166, %167 : vector<16x1xf32>
    %169 = vector.broadcast %161 : vector<16x1xf32> to vector<16x32xf32>
    %170 = arith.subf %157, %169 : vector<16x32xf32>
    %cst_54 = arith.constant 9.99999974E-6 : f32
    %171 = vector.broadcast %cst_54 : f32 to vector<16x1xf32>
    %172 = arith.addf %168, %171 : vector<16x1xf32>
    %173 = math.rsqrt %172 : vector<16x1xf32>
    %174 = vector.broadcast %173 : vector<16x1xf32> to vector<16x32xf32>
    %175 = arith.mulf %170, %174 : vector<16x32xf32>
    %176 = vector.broadcast %6 : vector<1x32xf32> to vector<16x32xf32>
    %177 = arith.mulf %175, %176 : vector<16x32xf32>
    %178 = vector.broadcast %7 : vector<1x32xf32> to vector<16x32xf32>
    %179 = arith.addf %177, %178 : vector<16x32xf32>
    %c0_55 = arith.constant 0 : index
    %c256 = arith.constant 256 : index
    %180 = vector.load %arg3[%c0_55, %c256] : memref<64x352xf32, #tpu.memory_space<vmem>>, vector<32x64xf32>
    %cst_56 = arith.constant dense<0.000000e+00> : vector<16x64xf32>
    %181 = tpu.matmul %179, %180, %cst_56 {dimension_numbers = #tpu.dot_dimension_numbers<[1], [0], [0], [1], [0, 0, 1, 1], [], []>} : vector<16x32xf32>, vector<32x64xf32>, vector<16x64xf32> -> vector<16x64xf32>
    %182 = vector.broadcast %13 : vector<1x64xf32> to vector<16x64xf32>
    %183 = arith.addf %181, %182 : vector<16x64xf32>
    %cst_57 = arith.constant 0.000000e+00 : f32
    %184 = vector.broadcast %cst_57 : f32 to vector<16x64xf32>
    %185 = arith.maximumf %183, %184 : vector<16x64xf32>
    %c0_58 = arith.constant 0 : index
    %c320 = arith.constant 320 : index
    %186 = vector.load %arg3[%c0_58, %c320] : memref<64x352xf32, #tpu.memory_space<vmem>>, vector<64x32xf32>
    %cst_59 = arith.constant dense<0.000000e+00> : vector<16x32xf32>
    %187 = tpu.matmul %185, %186, %cst_59 {dimension_numbers = #tpu.dot_dimension_numbers<[1], [0], [0], [1], [0, 0, 1, 1], [], []>} : vector<16x64xf32>, vector<64x32xf32>, vector<16x32xf32> -> vector<16x32xf32>
    %188 = vector.broadcast %14 : vector<1x32xf32> to vector<16x32xf32>
    %189 = arith.addf %187, %188 : vector<16x32xf32>
    %190 = arith.addf %157, %189 : vector<16x32xf32>
    %c0_60 = arith.constant 0 : index
    %c0_61 = arith.constant 0 : index
    %191 = vector.load %arg6[%c0_60, %c0_61] : memref<16x32xf32, #tpu.memory_space<vmem>>, vector<16x32xf32>
    tpu.vector_store %arg6[%c0_60, %c0_61], %190 {strides = array<i32>} : memref<16x32xf32, #tpu.memory_space<vmem>>, vector<16x32xf32>,
    return
  }
  func.func @transform_0(%arg0: i32) -> (i32, i32) {
    %c0_i32 = arith.constant 0 : i32
    %c0_i32_0 = arith.constant 0 : i32
    %c0_i32_1 = arith.constant 0 : i32
    return %c0_i32, %c0_i32_0 : i32, i32
  }
  func.func @transform_1(%arg0: i32) -> (i32, i32) {
    %c0_i32 = arith.constant 0 : i32
    %c0_i32_0 = arith.constant 0 : i32
    %c0_i32_1 = arith.constant 0 : i32
    return %c0_i32, %c0_i32_0 : i32, i32
  }
  func.func @transform_2(%arg0: i32) -> (i32, i32) {
    %c0_i32 = arith.constant 0 : i32
    %c0_i32_0 = arith.constant 0 : i32
    %c0_i32_1 = arith.constant 0 : i32
    return %c0_i32, %c0_i32_0 : i32, i32
  }
  func.func @transform_3(%arg0: i32) -> (i32, i32) {
    %c0_i32 = arith.constant 0 : i32
    %c0_i32_0 = arith.constant 0 : i32
    %c0_i32_1 = arith.constant 0 : i32
    return %c0_i32, %c0_i32_0 : i32, i32
  }
  func.func @transform_4(%arg0: i32) -> (i32, i32) {
    %c0_i32 = arith.constant 0 : i32
    %c0_i32_0 = arith.constant 0 : i32
    %c0_i32_1 = arith.constant 0 : i32
    return %c0_i32, %c0_i32_0 : i32, i32
  }
  func.func @transform_5(%arg0: i32) -> (i32, i32) {
    %c0_i32 = arith.constant 0 : i32
    %c0_i32_0 = arith.constant 0 : i32
    %c0_i32_1 = arith.constant 0 : i32
    return %c0_i32, %c0_i32_0 : i32, i32
  }
}

</mosaic_0001>

<bundles_post_ra>
// kernel: tpu_custom_call.1
= control target key start
LH: loop header
LB: loop body
LE: loop exit
PB: predicated region body
PF: predicated region fallthrough
CT: control target
= control target key end

     0   :  { %10 = vsyncpa [#allocation3], 0  ;;  %s2397_s0 = inlined_call_operand.hbm [shape: f32[16,32], index: 0, kind: input, shape index: {}]   ;;  %s2398_s1 = inlined_call_operand.hbm [shape: f32[24,32], index: 1, kind: input, shape index: {}]   ;;  %s2399_s2 = inlined_call_operand.hbm [shape: f32[64,352], index: 2, kind: input, shape index: {}]   ;;  %s2400_s3 = inlined_call_operand.hbm [shape: f32[13,96], index: 3, kind: input, shape index: {}]   ;;  %s2401_s4 = inlined_call_operand.hbm [shape: f32[64,160], index: 4, kind: input, shape index: {}]   ;;  %s2402_s5 = inlined_call_operand.hbm [shape: f32[16,32], index: 5, kind: output, shape index: {}]  }
   0x1   :  { %11 = vsyncpa [#allocation6], 0 }
   0x2   :  { %12 = vsyncpa [#allocation9], 0 }
   0x3   :  { %13 = vsyncpa [#allocation4], 0  ;;  %s31_s20 = sshll.u32 %s2398_s1, 4  ;;  %s1821_s21 = smov [#allocation5]   ;;  %s32_s20 = int_to_ptr.hbm [resolvable:$true] %s31_s20 }
   0x4   :  { %s33_s22 = sshll.u32 %s1821_s21, 4  ;;  %s57_s25 = sshll.u32 %s2400_s3, 4  ;;  %s34_s22 = int_to_ptr.vmem [resolvable:$true] %s33_s22  ;;  %s58_s25 = int_to_ptr.hbm [resolvable:$true] %s57_s25 }
   0x5   :  { %s1822_s26 = smov 128   ;;  %s1823_s27 = smov 8  }
   0x6   :  { %39 = dma.hbm_to_vmem [thread:$0]  %s32_s20, 384, %s34_s22, [#allocation6], %s1822_s26, %s1822_s26, %s1823_s27  }
   0x7   :  { %s1824_s28 = smov [#allocation8]   ;;  %s18_s1 = sshll.u32 %s2397_s0, 4  ;;  %s19_s1 = int_to_ptr.hbm [resolvable:$true] %s18_s1 }
   0x8   :  { %s59_s29 = sshll.u32 %s1824_s28, 4  ;;  %s44_s8 = sshll.u32 %s2399_s2, 4  ;;  %s60_s29 = int_to_ptr.vmem [resolvable:$true] %s59_s29  ;;  %s45_s8 = int_to_ptr.hbm [resolvable:$true] %s44_s8 }
   0x9   :  { %65 = dma.hbm_to_vmem [thread:$0]  %s58_s25, 256, %s60_s29, [#allocation9], %s1822_s26, %s1822_s26, %s1823_s27  }
   0xa   :  { %s1825_s9 = smov [#allocation2]   ;;  %s1826_s11 = smov [#allocation7]  }
   0xb   :  { %s20_s10 = sshll.u32 %s1825_s9, 4  ;;  %s46_s0 = sshll.u32 %s1826_s11, 4  ;;  %s21_s10 = int_to_ptr.vmem [resolvable:$true] %s20_s10  ;;  %s47_s0 = int_to_ptr.vmem [resolvable:$true] %s46_s0 }
   0xc   :  { %26 = dma.hbm_to_vmem [thread:$0]  %s19_s1, 256, %s21_s10, [#allocation3], %s1822_s26, %s1822_s26, %s1823_s27  }
   0xd   :  { %s1827_s12 = smov 384   ;;  %s1828_s13 = smov 24  }
   0xe   :  { %52 = dma.hbm_to_vmem [thread:$0]  %s45_s8, 3072, %s47_s0, [#allocation6], %s1827_s12, %s1827_s12, %s1828_s13  }
   0xf   :  { %s70_s16 = sshll.u32 %s2401_s4, 4  ;;  %s1829_s2 = smov [#allocation10]   ;;  %s71_s16 = int_to_ptr.hbm [resolvable:$true] %s70_s16 }
  0x10   :  { %s72_s17 = sshll.u32 %s1829_s2, 4  ;;  %s1830_s18 = smov 256   ;;  %s73_s17 = int_to_ptr.vmem [resolvable:$true] %s72_s17 }
  0x11   :  { %s1831_s19 = smov 16  }
  0x12   :  { %78 = dma.hbm_to_vmem [thread:$0]  %s71_s16, 2048, %s73_s17, [#allocation9], %s1830_s18, %s1830_s18, %s1831_s19  }
  0x13   :  { %1813 = dma.done.wait [#allocation3], 256  }
  0x14   :  { %1814 = vsyncadd [#allocation3], 4294967040 }
  0x15   :  { %1815 = dma.done.wait [#allocation6], 3456  }
  0x16   :  { %1816 = vsyncadd [#allocation6], 4294963840 }
  0x17   :  { %1817 = dma.done.wait [#allocation9], 2304  }
  0x18   :  { %1818 = vsyncadd [#allocation9], 4294964992  ;;  %vm133_vm0 = vcmask 261120   ;;  %v1896_v0 = vld [vmem:[#allocation2] sm:$0xff]  ;;  %v1900_v2 = vld [vmem:[#allocation2 + $0x8] sm:$0xff]  ;;  %v1832_v4 = vmov 32.0  }
  0x19   :  { %v134_v1 = vsel %vm133_vm0, %v1896_v0, 0.0  ;;  %v137_v3 = vsel %vm133_vm0, %v1900_v2, 0.0  ;;  %1591 = vrcp.f32 %v1832_v4  ;;  %v1912_v21 = vld [vmem:[#allocation7 + $0x48] sm:$0xff]  ;;  %v1915_v22 = vld [vmem:[#allocation7 + $0x30] sm:$0xff]  ;;  %v1918_v23 = vld [vmem:[#allocation7 + $0x18] sm:$0xff]  ;;  %s1833_s4 = smov 112  }
  0x1a   :  { %135 = vadd.xlane.f32.xlu0 %v134_v1  ;;  %214 = vmatpush.msra.mxu1 %v1912_v21  ;;  %v1921_v24 = vld [vmem:[#allocation7] sm:$0xff]  ;;  %v1498_v25 = vpack.i.bf16 %v1915_v22, %v1912_v21  ;;  %s1834_s20 = smov 104   ;;  %s1835_s21 = smov 120   ;;  %vm269_vm8 = vcmask 64512   ;;  %vm351_vm9 = vcmask 523264   ;;  %vm555_vm10 = vcmask 130048  }
  0x1b   :  { %v1503_v26 = vpack.i.bf16 %v1921_v24, %v1918_v23  ;;  %v1578_v41 = vld [vmem:[#allocation8 + $0x3] ss:$0 sm:$0xff]  ;;  %v1579_v45 = vld [vmem:[#allocation8 + $0x4] ss:$0 sm:$0xff]  ;;  %v1580_v55 = vld [vmem:[#allocation8] ss:$0 sm:$0xff] }
  0x1c   :  { %215 = vmatpush.msra.mxu1 %v1915_v22  ;;  %s1836_s22 = smov 96   ;;  %s1837_s23 = smov 64   ;;  %vm558_vm11 = vcmask 195584  }
  0x1d   :  { %s1838_s24 = smov 32   ;;  %s1839_s25 = smov [#allocation11]  }
  0x1e   :  { %216 = vmatpush.msra.mxu1 %v1918_v23  ;;  %s1375_s28 = sshll.u32 %s1839_s25, 4  ;;  %s1377_s6 = sshll.u32 %s2402_s5, 4  ;;  %s1376_s28 = int_to_ptr.vmem [resolvable:$true] %s1375_s28  ;;  %s1378_s6 = int_to_ptr.hbm [resolvable:$true] %s1377_s6 }
  0x1f   :  { %v1592_v5 = vpop.eup %1591 }
  0x20   :  { %v141_v6 = vmul.f32 32.0, %v1592_v5  ;;  %vm145_vm1 = vweird.f32 %v1592_v5  ;;  %217 = vmatpush.msra.mxu1 %v1921_v24 }
  0x22   :  { %138 = vadd.xlane.f32.xlu0 %v137_v3  ;;  %v142_v7 = vsub.f32 1.0, %v141_v6 }
  0x24   :  { %v143_v8 = vmul.f32 %v1592_v5, %v142_v7 }
  0x26   :  { %v144_v9 = vadd.f32 %v1592_v5, %v143_v8 }
  0x28   :  { %v1904_v10 = vsel %vm145_vm1, %v1592_v5, %v144_v9 }
  0x8d   :  { %v136_v11 = vpop.xlane.xlu0 %135 }
  0x8e   :  { %v147_v12 = vmul.f32 %v1904_v10, %v136_v11 }
  0x90   :  { %v149_v13 = vsub.f32 %v1896_v0, %v147_v12 }
  0x92   :  { %v151_v14 = vmul.f32 %v149_v13, %v149_v13 }
  0x94   :  { %v153_v15 = vsel %vm133_vm0, %v151_v14, 0.0 }
  0x95   :  { %154 = vadd.xlane.f32.xlu1 %v153_v15  ;;  %v139_v16 = vpop.xlane.xlu0 %138 }
  0x96   :  { %v148_v17 = vmul.f32 %v1904_v10, %v139_v16 }
  0x98   :  { %v150_v18 = vsub.f32 %v1900_v2, %v148_v17 }
  0x9a   :  { %v152_v19 = vmul.f32 %v150_v18, %v150_v18 }
  0x9c   :  { %v156_v20 = vsel %vm133_vm0, %v152_v19, 0.0 }
  0x9d   :  { %157 = vadd.xlane.f32.xlu1 %v156_v20 }
 0x108   :  { %v155_v27 = vpop.xlane.xlu1 %154 }
 0x109   :  { %v159_v28 = vmul.f32 %v155_v27, %v1904_v10 }
 0x10b   :  { %v161_v29 = vadd.f32 1e-05, %v159_v28  ;;  %v2002_v28 = vld [vmem:[#allocation10] sm:$0xff] }
 0x10d   :  { %1593 = vrsqrt.f32 %v161_v29  ;;  %vm169_vm3 = vweird.f32 %v161_v29 }
 0x110   :  { %v158_v30 = vpop.xlane.xlu1 %157 }
 0x111   :  { %v160_v31 = vmul.f32 %v158_v30, %v1904_v10 }
 0x113   :  { %v1594_v32 = vpop.eup %1593  ;;  %v162_v33 = vadd.f32 1e-05, %v160_v31 }
 0x114   :  { %v164_v34 = vmul.f32 %v1594_v32, %v161_v29  ;;  %vm170_vm2 = vweird.f32 %v1594_v32 }
 0x115   :  { %1595 = vrsqrt.f32 %v162_v33  ;;  %vm171_vm4 = vmor %vm169_vm3, %vm170_vm2  ;;  %vm179_vm6 = vweird.f32 %v162_v33  ;;  %vm947_vm3 = vcmask 785408  }
 0x116   :  { %v165_v35 = vmul.f32 %v1594_v32, %v164_v34 }
 0x118   :  { %v166_v36 = vmul.f32 0.5, %v165_v35 }
 0x11a   :  { %v167_v37 = vsub.f32 1.5, %v166_v36  ;;  %v2010_v36 = vld [vmem:[#allocation10 + $0x20] sm:$0xff] }
 0x11b   :  { %v1596_v38 = vpop.eup %1595 }
 0x11c   :  { %v168_v39 = vmul.f32 %v1594_v32, %v167_v37  ;;  %v174_v40 = vmul.f32 %v1596_v38, %v162_v33  ;;  %vm180_vm5 = vweird.f32 %v1596_v38 }
 0x11d   :  { %vm181_vm7 = vmor %vm179_vm6, %vm180_vm5 }
 0x11e   :  { %v172_v42 = vsel %vm171_vm4, %v1594_v32, %v168_v39  ;;  %v175_v43 = vmul.f32 %v1596_v38, %v174_v40  ;;  %v2006_v32 = vld [vmem:[#allocation10 + $0x10] sm:$0xff] }
 0x11f   :  { %v183_v44 = vmul.f32 %v172_v42, %v149_v13  ;;  %v2017_v40 = vld [vmem:[#allocation10 + $0x30] sm:$0xff] }
 0x120   :  { %v176_v46 = vmul.f32 0.5, %v175_v43 }
 0x121   :  { %v186_v47 = vmul.f32 %v1578_v41, %v183_v44  ;;  %v2021_v44 = vld [vmem:[#allocation10 + $0x40] sm:$0xff] }
 0x122   :  { %v177_v48 = vsub.f32 1.5, %v176_v46 }
 0x123   :  { %v189_v49 = vadd.f32 %v1579_v45, %v186_v47 }
 0x124   :  { %v178_v50 = vmul.f32 %v1596_v38, %v177_v48 }
 0x125   :  { %1392 = vmatmul.msk.f32.vlgmr.msra.gmra.mxu1 %vm133_vm0, %v189_v49 }
 0x126   :  { %v182_v51 = vsel %vm181_vm7, %v1596_v38, %v178_v50  ;;  %v2028_v50 = vld [vmem:[#allocation10 + $0x60] sm:$0xff] }
 0x127   :  { %v184_v52 = vmul.f32 %v182_v51, %v150_v18 }
 0x129   :  { %v187_v53 = vmul.f32 %v1578_v41, %v184_v52 }
 0x12b   :  { %v190_v54 = vadd.f32 %v1579_v45, %v187_v53 }
 0x12d   :  { %1393 = vmatmul.msk.f32.gmra.mxu1 %vm133_vm0, %v190_v54  ;;  %v2036_v54 = vld [vmem:[#allocation10 + $0x50] sm:$0xff] }
 0x1a2   :  { %v219_v56 = vpop.f32.mrf.mxu1 }
 0x1a3   :  { %v1932_v57 = vadd.f32 %v1580_v55, %v219_v56 }
 0x1a5   :  { %233 = vrot.lane.b32.xlu1 %v1932_v57, %s1833_s4  ;;  %v245_v14 = vmul.f32 0.35355338, %v1932_v57 }
 0x1aa   :  { %v222_v58 = vpop.f32.mrf.mxu1 }
 0x1ab   :  { %v1936_v59 = vadd.f32 %v1580_v55, %v222_v58  ;;  %v2043_v58 = vld [vmem:[#allocation10 + $0x70] sm:$0xff] }
 0x1ad   :  { %235 = vrot.lane.b32.xlu0 %v1936_v59, %s1833_s4  ;;  %241 = vrot.lane.b32.xlu2 %v1936_v59, %s1834_s20  ;;  %v246_v15 = vmul.f32 0.35355338, %v1936_v59 }
 0x1b5   :  { %239 = vrot.lane.b32.xlu2 %v1932_v57, %s1834_s20 }
 0x1bd   :  { %229 = vrot.lane.b32.xlu2 %v1936_v59, %s1835_s21 }
 0x1c5   :  { %227 = vrot.lane.b32.xlu2 %v1932_v57, %s1835_s21 }
 0x207   :  { %v1948_v60 = vpop.permute.xlu2 %241 }
 0x208   :  { %267 = vrot.lane.b32.xlu2 %v1948_v60, %s1836_s22  ;;  %v252_v27 = vmul.f32 0.35355338, %v1948_v60 }
 0x20f   :  { %v1952_v61 = vpop.permute.xlu2 %239 }
 0x210   :  { %v1478_v62 = vpack.i.bf16 %v1952_v61, %v1948_v60  ;;  %265 = vrot.lane.b32.xlu0 %v1952_v61, %s1836_s22  ;;  %v251_v20 = vmul.f32 0.35355338, %v1952_v61  ;;  %v1493_v60 = vpack.i.bf16 %v1932_v57, %v1936_v59 }
 0x217   :  { %v1958_v63 = vpop.permute.xlu2 %229  ;;  %v1960_v1 = vpop.permute.xlu1 %233 }
 0x218   :  { %259 = vrot.lane.b32.xlu0 %v1958_v63, %s1836_s22  ;;  %261 = vrot.lane.b32.xlu1 %v1960_v1, %s1836_s22  ;;  %v248_v17 = vmul.f32 0.35355338, %v1958_v63  ;;  %v249_v18 = vmul.f32 0.35355338, %v1960_v1 }
 0x21f   :  { %v1966_v3 = vpop.permute.xlu0 %235  ;;  %v1974_v4 = vpop.permute.xlu2 %227 }
 0x220   :  { %263 = vrot.lane.b32.xlu2 %v1966_v3, %s1836_s22  ;;  %253 = vrot.lane.b32.xlu0 %v1932_v57, %s1836_s22  ;;  %v247_v16 = vmul.f32 0.35355338, %v1974_v4  ;;  %v250_v19 = vmul.f32 0.35355338, %v1966_v3  ;;  %v1483_v48 = vpack.i.bf16 %v1960_v1, %v1966_v3 }
 0x221   :  { %255 = vrot.lane.b32.xlu1 %v1936_v59, %s1836_s22 }
 0x228   :  { %257 = vrot.lane.b32.xlu2 %v1974_v4, %s1836_s22 }
 0x262   :  { %v268_v5 = vpop.permute.xlu2 %267 }
 0x263   :  { %1394 = vmatpush.xpose.msk.msrb.mxu1 %vm269_vm8, %v268_v5 }
 0x27a   :  { %v264_v7 = vpop.permute.xlu2 %263 }
 0x282   :  { %v266_v6 = vpop.permute.xlu0 %265  ;;  %v258_v11 = vpop.permute.xlu2 %257 }
 0x283   :  { %1395 = vmatpush.xpose.msk.msrb.mxu1 %vm269_vm8, %v266_v6 }
 0x287   :  { %1396 = vmatpush.xpose.msk.msrb.mxu1 %vm269_vm8, %v264_v7 }
 0x28a   :  { %v262_v8 = vpop.permute.xlu1 %261  ;;  %v260_v9 = vpop.permute.xlu0 %259 }
 0x28b   :  { %1397 = vmatpush.xpose.msk.msrb.mxu1 %vm269_vm8, %v262_v8 }
 0x28f   :  { %1398 = vmatpush.xpose.msk.msrb.mxu1 %vm269_vm8, %v260_v9 }
 0x292   :  { %v254_v13 = vpop.permute.xlu0 %253 }
 0x293   :  { %1399 = vmatpush.xpose.msk.msrb.mxu1 %vm269_vm8, %v258_v11  ;;  %v256_v12 = vpop.permute.xlu1 %255 }
 0x297   :  { %1400 = vmatpush.xpose.msk.msrb.mxu1 %vm269_vm8, %v256_v12 }
 0x29b   :  { %1401 = vmatpush.xpose.msk.msrb.mxu1 %vm269_vm8, %v254_v13 }
 0x29e   :  { %1402 = vmatmul.msk.f32.vlgmr.msrb.gmra.mxu1 %vm269_vm8, %v245_v14 }
 0x2a6   :  { %1403 = vmatmul.msk.f32.gmra.mxu1 %vm269_vm8, %v246_v15 }
 0x2ae   :  { %1404 = vmatmul.msk.f32.gmra.mxu1 %vm269_vm8, %v247_v16 }
 0x2b6   :  { %1405 = vmatmul.msk.f32.gmra.mxu1 %vm269_vm8, %v248_v17 }
 0x2be   :  { %1406 = vmatmul.msk.f32.gmra.mxu1 %vm269_vm8, %v249_v18 }
 0x2c6   :  { %1407 = vmatmul.msk.f32.gmra.mxu1 %vm269_vm8, %v250_v19 }
 0x2ce   :  { %1408 = vmatmul.msk.f32.gmra.mxu1 %vm269_vm8, %v251_v20 }
 0x2d6   :  { %1409 = vmatmul.msk.f32.gmra.mxu1 %vm269_vm8, %v252_v27 }
 0x31b   :  { %v327_v29 = vpop.f32.mrf.mxu1 }
 0x31c   :  { %v328_v30 = vadd.f32 %v327_v29, %v2002_v28 }
 0x31e   :  { %v352_v31 = vsel %vm351_vm9, %v328_v30, -inf }
 0x31f   :  { %353 = vmax.xlane.f32.xlu2 %v352_v31 }
 0x323   :  { %v330_v33 = vpop.f32.mrf.mxu1 }
 0x324   :  { %v331_v34 = vadd.f32 %v330_v33, %v2006_v32  ;;  %v1488_v33 = vpack.i.bf16 %v1974_v4, %v1958_v63 }
 0x326   :  { %v355_v35 = vsel %vm351_vm9, %v331_v34, -inf }
 0x327   :  { %356 = vmax.xlane.f32.xlu1 %v355_v35 }
 0x32b   :  { %v333_v37 = vpop.f32.mrf.mxu1 }
 0x32c   :  { %v2013_v38 = vadd.f32 %v333_v37, %v2010_v36 }
 0x32e   :  { %v358_v39 = vsel %vm351_vm9, %v2013_v38, -inf }
 0x32f   :  { %359 = vmax.xlane.f32.xlu0 %v358_v39 }
 0x333   :  { %v336_v41 = vpop.f32.mrf.mxu1 }
 0x334   :  { %v337_v42 = vadd.f32 %v336_v41, %v2017_v40 }
 0x336   :  { %v361_v43 = vsel %vm351_vm9, %v337_v42, -inf }
 0x337   :  { %362 = vmax.xlane.f32.xlu2 %v361_v43 }
 0x33b   :  { %v339_v45 = vpop.f32.mrf.mxu1 }
 0x33c   :  { %v340_v46 = vadd.f32 %v339_v45, %v2021_v44 }
 0x33e   :  { %v364_v47 = vsel %vm351_vm9, %v340_v46, -inf }
 0x33f   :  { %365 = vmax.xlane.f32.xlu1 %v364_v47 }
 0x343   :  { %v342_v49 = vpop.f32.mrf.mxu1  ;;  %1484 = vrot.lane.b32.xlu0 %v1483_v48, %s1837_s23 }
 0x344   :  { %v2039_v55 = vadd.f32 %v342_v49, %v2036_v54 }
 0x346   :  { %v367_v56 = vsel %vm351_vm9, %v2039_v55, -inf }
 0x34b   :  { %v345_v51 = vpop.f32.mrf.mxu1 }
 0x34c   :  { %v346_v52 = vadd.f32 %v345_v51, %v2028_v50 }
 0x34e   :  { %v370_v53 = vsel %vm351_vm9, %v346_v52, -inf }
 0x34f   :  { %371 = vmax.xlane.f32.xlu1 %v370_v53  ;;  %1479 = vrot.lane.b32.xlu2 %v1478_v62, %s1837_s23 }
 0x353   :  { %v348_v1 = vpop.f32.mrf.mxu1 }
 0x354   :  { %v2046_v3 = vadd.f32 %v348_v1, %v2043_v58 }
 0x356   :  { %v373_v5 = vsel %vm351_vm9, %v2046_v3, -inf }
 0x36d   :  { %368 = vmax.xlane.f32.xlu0 %v367_v56 }
 0x378   :  { %374 = vmax.xlane.f32.xlu2 %v373_v5 }
 0x381   :  { %1494 = vrot.lane.b32.xlu0 %v1493_v60, %s1837_s23 }
 0x392   :  { %v354_v61 = vpop.xlane.xlu2 %353 }
 0x393   :  { %v376_v62 = vsub.f32 %v328_v30, %v354_v61 }
 0x395   :  { %v384_v6 = vmul.f32 1.442695, %v376_v62 }
 0x397   :  { %1597 = vpow2.f32 %v384_v6 }
 0x39a   :  { %v357_v7 = vpop.xlane.xlu1 %356 }
 0x39b   :  { %v377_v8 = vsub.f32 %v331_v34, %v357_v7 }
 0x39d   :  { %v2053_v9 = vpop.eup %1597  ;;  %v386_v11 = vmul.f32 1.442695, %v377_v8 }
 0x39e   :  { %v400_v12 = vsel %vm351_vm9, %v2053_v9, 0.0 }
 0x39f   :  { %401 = vadd.xlane.f32.xlu1 %v400_v12  ;;  %1599 = vpow2.f32 %v386_v11 }
 0x3a2   :  { %v360_v15 = vpop.xlane.xlu0 %359 }
 0x3a5   :  { %v2057_v13 = vpop.eup %1599 }
 0x3a6   :  { %v403_v57 = vsel %vm351_vm9, %v2057_v13, 0.0 }
 0x3aa   :  { %v363_v14 = vpop.xlane.xlu2 %362 }
 0x3ab   :  { %v379_v59 = vsub.f32 %v337_v42, %v363_v14  ;;  %404 = vadd.xlane.f32.xlu0 %v403_v57 }
 0x3ad   :  { %v390_v16 = vmul.f32 1.442695, %v379_v59 }
 0x3af   :  { %1601 = vpow2.f32 %v390_v16 }
 0x3b2   :  { %v366_v17 = vpop.xlane.xlu1 %365  ;;  %v1480_v18 = vpop.permute.xlu2 %1479 }
 0x3b3   :  { %v380_v19 = vsub.f32 %v340_v46, %v366_v17  ;;  %v1481_v20 = vunpack.i.l.bf16 %v1480_v18  ;;  %v1482_v31 = vunpack.i.h.bf16 %v1480_v18  ;;  %v378_v46 = vsub.f32 %v2013_v38, %v360_v15 }
 0x3b5   :  { %v2061_v27 = vpop.eup %1601  ;;  %v392_v29 = vmul.f32 1.442695, %v380_v19  ;;  %v1485_v30 = vpop.permute.xlu0 %1484  ;;  %496 = vmatpush.msra.mxu2 %v1481_v20  ;;  %v388_v47 = vmul.f32 1.442695, %v378_v46 }
 0x3b6   :  { %v409_v34 = vsel %vm351_vm9, %v2061_v27, 0.0  ;;  %v1486_v35 = vunpack.i.l.bf16 %v1485_v30  ;;  %v1487_v37 = vunpack.i.h.bf16 %v1485_v30 }
 0x3b7   :  { %1603 = vpow2.f32 %v392_v29  ;;  %410 = vadd.xlane.f32.xlu2 %v409_v34  ;;  %497 = vmatpush.msra.mxu2 %v1482_v31 }
 0x3b8   :  { %1489 = vrot.lane.b32.xlu1 %v1488_v33, %s1837_s23 }
 0x3b9   :  { %498 = vmatpush.msra.mxu2 %v1486_v35 }
 0x3bb   :  { %499 = vmatpush.msra.mxu2 %v1487_v37 }
 0x3bd   :  { %v2068_v39 = vpop.eup %1603 }
 0x3be   :  { %v412_v41 = vsel %vm351_vm9, %v2068_v39, 0.0 }
 0x3bf   :  { %413 = vadd.xlane.f32.xlu2 %v412_v41 }
 0x3c2   :  { %v372_v42 = vpop.xlane.xlu1 %371 }
 0x3c3   :  { %v382_v63 = vsub.f32 %v346_v52, %v372_v42 }
 0x3c5   :  { %v396_v4 = vmul.f32 1.442695, %v382_v63 }
 0x3c7   :  { %1605 = vpow2.f32 %v396_v4 }
 0x3c8   :  { %1607 = vpow2.f32 %v388_v47 }
 0x3cd   :  { %v2072_v43 = vpop.eup %1605 }
 0x3ce   :  { %v418_v45 = vsel %vm351_vm9, %v2072_v43, 0.0  ;;  %v1608_v48 = vpop.eup %1607 }
 0x3cf   :  { %419 = vadd.xlane.f32.xlu2 %v418_v45  ;;  %v406_v53 = vsel %vm351_vm9, %v1608_v48, 0.0 }
 0x3e0   :  { %v369_v49 = vpop.xlane.xlu0 %368 }
 0x3e1   :  { %v381_v51 = vsub.f32 %v2039_v55, %v369_v49 }
 0x3e2   :  { %407 = vadd.xlane.f32.xlu1 %v406_v53  ;;  %v659_v53 = vld [vmem:[#allocation7 + $0x8] sm:$0xff] }
 0x3e3   :  { %v394_v52 = vmul.f32 1.442695, %v381_v51 }
 0x3e5   :  { %1609 = vpow2.f32 %v394_v52  ;;  %v660_v52 = vld [vmem:[#allocation7 + $0x20] sm:$0xff] }
 0x3eb   :  { %v1610_v56 = vpop.eup %1609  ;;  %v375_v1 = vpop.xlane.xlu2 %374 }
 0x3ec   :  { %v383_v5 = vsub.f32 %v2046_v3, %v375_v1  ;;  %v415_v60 = vsel %vm351_vm9, %v1610_v56, 0.0  ;;  %v2109_v1 = vpack.i.bf16 %v659_v53, %v660_v52 }
 0x3ed   :  { %416 = vadd.xlane.f32.xlu0 %v415_v60 }
 0x3ee   :  { %v398_v61 = vmul.f32 1.442695, %v383_v5  ;;  %v662_v5 = vld [vmem:[#allocation7 + $0x50] sm:$0xff] }
 0x3ef   :  { %682 = vmatpush.msra.mxu0 %v662_v5 }
 0x3f0   :  { %1611 = vpow2.f32 %v398_v61 }
 0x3f3   :  { %v1495_v55 = vpop.permute.xlu0 %1494 }
 0x3f4   :  { %v1496_v3 = vunpack.i.l.bf16 %v1495_v55  ;;  %v1497_v57 = vunpack.i.h.bf16 %v1495_v55 }
 0x3f6   :  { %v1612_v38 = vpop.eup %1611 }
 0x3f7   :  { %v421_v62 = vsel %vm351_vm9, %v1612_v38, 0.0 }
 0x3f8   :  { %422 = vadd.xlane.f32.xlu0 %v421_v62 }
 0x3fb   :  { %1499 = vrot.lane.b32.xlu1 %v1498_v25, %s1838_s24 }
 0x40c   :  { %1504 = vrot.lane.b32.xlu0 %v1503_v26, %s1838_s24 }
 0x412   :  { %v402_v6 = vpop.xlane.xlu1 %401 }
 0x413   :  { %1613 = vrcp.f32 %v402_v6 }
 0x419   :  { %v1614_v14 = vpop.eup %1613 }
 0x41a   :  { %v432_v59 = vmul.f32 %v1614_v14, %v2053_v9 }
 0x41e   :  { %v405_v12 = vpop.xlane.xlu0 %404 }
 0x41f   :  { %1615 = vrcp.f32 %v405_v12 }
 0x425   :  { %v1616_v15 = vpop.eup %1615 }
 0x426   :  { %v433_v16 = vmul.f32 %v1616_v15, %v2057_v13 }
 0x42a   :  { %v1490_v7 = vpop.permute.xlu1 %1489  ;;  %v411_v18 = vpop.xlane.xlu2 %410 }
 0x42b   :  { %v1491_v8 = vunpack.i.l.bf16 %v1490_v7  ;;  %v1492_v11 = vunpack.i.h.bf16 %v1490_v7 }
 0x42d   :  { %500 = vmatpush.msra.mxu2 %v1491_v8 }
 0x42f   :  { %501 = vmatpush.msra.mxu2 %v1492_v11 }
 0x431   :  { %502 = vmatpush.msra.mxu2 %v1496_v3 }
 0x432   :  { %v414_v29 = vpop.xlane.xlu2 %413 }
 0x433   :  { %503 = vmatpush.msra.mxu2 %v1497_v57 }
 0x434   :  { %1410 = vmatmul.msk.f32.vlgmr.msra.gmra.mxu2 %vm351_vm9, %v432_v59 }
 0x43c   :  { %1411 = vmatmul.msk.f32.gmra.mxu2 %vm351_vm9, %v433_v16 }
 0x455   :  { %v408_v17 = vpop.xlane.xlu1 %407 }
 0x456   :  { %1617 = vrcp.f32 %v408_v17 }
 0x457   :  { %1619 = vrcp.f32 %v411_v18 }
 0x458   :  { %1621 = vrcp.f32 %v414_v29  ;;  %v102_v29 = vld [vmem:[#allocation5 + $0x8] sm:$0xff] }
 0x45c   :  { %v1618_v19 = vpop.eup %1617 }
 0x45d   :  { %v434_v20 = vmul.f32 %v1618_v19, %v1608_v48  ;;  %v1620_v30 = vpop.eup %1619 }
 0x45e   :  { %v435_v9 = vmul.f32 %v1620_v30, %v2061_v27  ;;  %v1622_v33 = vpop.eup %1621  ;;  %v420_v27 = vpop.xlane.xlu2 %419  ;;  %v103_v30 = vld [vmem:[#allocation5 + $0x10] sm:$0xff] }
 0x45f   :  { %1412 = vmatmul.msk.f32.gmra.mxu2 %vm351_vm9, %v434_v20  ;;  %v436_v13 = vmul.f32 %v1622_v33, %v2068_v39  ;;  %v101_v20 = vld [vmem:[#allocation5] sm:$0xff] }
 0x460   :  { %v417_v31 = vpop.xlane.xlu0 %416 }
 0x461   :  { %1623 = vrcp.f32 %v417_v31 }
 0x462   :  { %1625 = vrcp.f32 %v420_v27 }
 0x467   :  { %1413 = vmatmul.msk.f32.gmra.mxu2 %vm351_vm9, %v435_v9  ;;  %v1624_v34 = vpop.eup %1623  ;;  %v1581_v9 = vld [vmem:[#allocation8 + $0xa] ss:$0 sm:$0xff] }
 0x468   :  { %v437_v35 = vmul.f32 %v1624_v34, %v1610_v56  ;;  %v1626_v41 = vpop.eup %1625  ;;  %v661_v56 = vld [vmem:[#allocation7 + $0x38] sm:$0xff] }
 0x469   :  { %v438_v21 = vmul.f32 %v1626_v41, %v2072_v43  ;;  %v2111_v60 = vpack.i.bf16 %v661_v56, %v662_v5  ;;  %683 = vmatpush.msra.mxu0 %v661_v56 }
 0x46b   :  { %v423_v37 = vpop.xlane.xlu0 %422  ;;  %684 = vmatpush.msra.mxu0 %v660_v52 }
 0x46c   :  { %1627 = vrcp.f32 %v423_v37 }
 0x46d   :  { %v1500_v45 = vpop.permute.xlu1 %1499  ;;  %685 = vmatpush.msra.mxu0 %v659_v53 }
 0x46e   :  { %v1501_v46 = vunpack.i.l.bf16 %v1500_v45  ;;  %v1502_v47 = vunpack.i.h.bf16 %v1500_v45 }
 0x46f   :  { %1414 = vmatmul.msk.f32.gmra.mxu2 %vm351_vm9, %v436_v13 }
 0x470   :  { %596 = vmatpush.msra.mxu3 %v1501_v46 }
 0x472   :  { %v1628_v22 = vpop.eup %1627  ;;  %597 = vmatpush.msra.mxu3 %v1502_v47 }
 0x473   :  { %v439_v23 = vmul.f32 %v1628_v22, %v1612_v38 }
 0x477   :  { %1415 = vmatmul.msk.f32.gmra.mxu2 %vm351_vm9, %v437_v35 }
 0x47e   :  { %v1505_v48 = vpop.permute.xlu0 %1504 }
 0x47f   :  { %1416 = vmatmul.msk.f32.gmra.mxu2 %vm351_vm9, %v438_v21  ;;  %v1506_v49 = vunpack.i.l.bf16 %v1505_v48  ;;  %v1507_v51 = vunpack.i.h.bf16 %v1505_v48 }
 0x481   :  { %598 = vmatpush.msra.mxu3 %v1506_v49 }
 0x483   :  { %599 = vmatpush.msra.mxu3 %v1507_v51 }
 0x487   :  { %1417 = vmatmul.msk.f32.gmra.mxu2 %vm351_vm9, %v439_v23 }
 0x4b7   :  { %v505_v24 = vpop.f32.mrf.mxu2 }
 0x4bf   :  { %v508_v25 = vpop.f32.mrf.mxu2 }
 0x4e2   :  { %v511_v26 = vpop.f32.mrf.mxu2 }
 0x4e3   :  { %531 = vrot.lane.b32.xlu2 %v511_v26, %s1823_s27 }
 0x4ea   :  { %v514_v39 = vpop.f32.mrf.mxu2 }
 0x4eb   :  { %533 = vrot.lane.b32.xlu2 %v514_v39, %s1823_s27 }
 0x4f2   :  { %v517_v42 = vpop.f32.mrf.mxu2 }
 0x4f3   :  { %539 = vrot.lane.b32.xlu1 %v517_v42, %s1831_s19  ;;  %1509 = vrot.lane.b32.xlu2 %v2111_v60, %s1836_s22 }
 0x4fa   :  { %v520_v63 = vpop.f32.mrf.mxu2 }
 0x4fb   :  { %541 = vrot.lane.b32.xlu1 %v520_v63, %s1831_s19 }
 0x502   :  { %v523_v4 = vpop.f32.mrf.mxu2 }
 0x503   :  { %547 = vrot.lane.b32.xlu0 %v523_v4, %s1828_s13  ;;  %1514 = vrot.lane.b32.xlu1 %v2109_v1, %s1836_s22 }
 0x50a   :  { %v526_v43 = vpop.f32.mrf.mxu2 }
 0x50b   :  { %549 = vrot.lane.b32.xlu0 %v526_v43, %s1828_s13  ;;  %v1582_v43 = vld [vmem:[#allocation8 + $0x1] ss:$0 sm:$0xff] }
 0x53d   :  { %v532_v61 = vpop.permute.xlu2 %531 }
 0x53e   :  { %v553_v62 = vsel %vm269_vm8, %v505_v24, %v532_v61 }
 0x545   :  { %v534_v8 = vpop.permute.xlu2 %533 }
 0x546   :  { %v554_v12 = vsel %vm269_vm8, %v508_v25, %v534_v8 }
 0x54d   :  { %v1510_v59 = vpop.permute.xlu2 %1509 }
 0x54e   :  { %v1511_v15 = vunpack.i.l.bf16 %v1510_v59  ;;  %v1512_v17 = vunpack.i.h.bf16 %v1510_v59 }
 0x550   :  { %731 = vmatpush.msrb.mxu3 %v1511_v15  ;;  %v1584_v15 = vld [vmem:[#allocation8 + $0x6] ss:$0 sm:$0xff] }
 0x552   :  { %732 = vmatpush.msrb.mxu3 %v1512_v17 }
 0x565   :  { %v540_v38 = vpop.permute.xlu1 %539 }
 0x566   :  { %v556_v6 = vsel %vm555_vm10, %v553_v62, %v540_v38 }
 0x56d   :  { %v542_v11 = vpop.permute.xlu1 %541 }
 0x56e   :  { %v557_v14 = vsel %vm555_vm10, %v554_v12, %v542_v11 }
 0x575   :  { %v548_v55 = vpop.permute.xlu0 %547  ;;  %v1515_v16 = vpop.permute.xlu1 %1514 }
 0x576   :  { %v559_v7 = vsel %vm558_vm11, %v556_v6, %v548_v55  ;;  %v1516_v18 = vunpack.i.l.bf16 %v1515_v16  ;;  %v1517_v19 = vunpack.i.h.bf16 %v1515_v16 }
 0x577   :  { %1418 = vmatmul.msk.f32.vlgmr.msra.gmra.mxu3 %vm133_vm0, %v559_v7 }
 0x578   :  { %733 = vmatpush.msrb.mxu3 %v1516_v18 }
 0x57a   :  { %734 = vmatpush.msrb.mxu3 %v1517_v19 }
 0x57d   :  { %v550_v3 = vpop.permute.xlu0 %549 }
 0x57e   :  { %v560_v57 = vsel %vm558_vm11, %v557_v14, %v550_v3  ;;  %v1583_v14 = vld [vmem:[#allocation8 + $0x5] ss:$0 sm:$0xff] }
 0x57f   :  { %1419 = vmatmul.msk.f32.gmra.mxu3 %vm133_vm0, %v560_v57 }
 0x587   :  { %1422 = vmatmul.msk.f32.vlgmr.msrb.gmra.mxu3 %vm133_vm0, %v101_v20 }
 0x58f   :  { %1423 = vmatmul.msk.f32.gmra.mxu3 %vm133_vm0, %v102_v29 }
 0x597   :  { %1424 = vmatmul.msk.f32.gmra.mxu3 %vm133_vm0, %v103_v30 }
 0x5fa   :  { %v601_v31 = vpop.f32.mrf.mxu3 }
 0x5fb   :  { %v602_v33 = vadd.f32 %v1581_v9, %v601_v31 }
 0x5fd   :  { %v2129_v13 = vadd.f32 %v602_v33, %v1896_v0 }
 0x5ff   :  { %v609_v27 = vsel %vm133_vm0, %v2129_v13, 0.0 }
 0x600   :  { %610 = vadd.xlane.f32.xlu0 %v609_v27 }
 0x602   :  { %v604_v34 = vpop.f32.mrf.mxu3 }
 0x603   :  { %v605_v35 = vadd.f32 %v1581_v9, %v604_v34 }
 0x605   :  { %v2134_v37 = vadd.f32 %v605_v35, %v1900_v2 }
 0x607   :  { %v612_v41 = vsel %vm133_vm0, %v2134_v37, 0.0 }
 0x608   :  { %613 = vadd.xlane.f32.xlu2 %v612_v41 }
 0x60a   :  { %v736_v21 = vpop.f32.mrf.mxu3 }
 0x60b   :  { %v2152_v48 = vadd.f32 %v1582_v43, %v736_v21 }
 0x612   :  { %v739_v42 = vpop.f32.mrf.mxu3 }
 0x613   :  { %v2150_v47 = vadd.f32 %v1582_v43, %v739_v42 }
 0x61a   :  { %v742_v45 = vpop.f32.mrf.mxu3 }
 0x61b   :  { %v2144_v46 = vadd.f32 %v1582_v43, %v742_v45  ;;  %v126_v45 = vld [vmem:[#allocation10 + $0x18] sm:$0xff] }
 0x620   :  { %792 = vrot.lane.b32.xlu2 %v2144_v46, %s1834_s20 }
 0x628   :  { %786 = vrot.lane.b32.xlu2 %v2144_v46, %s1833_s4 }
 0x630   :  { %780 = vrot.lane.b32.xlu2 %v2144_v46, %s1835_s21 }
 0x673   :  { %v611_v22 = vpop.xlane.xlu0 %610 }
 0x674   :  { %v615_v23 = vmul.f32 %v611_v22, %v1904_v10 }
 0x676   :  { %v617_v0 = vsub.f32 %v2129_v13, %v615_v23 }
 0x678   :  { %v619_v24 = vmul.f32 %v617_v0, %v617_v0 }
 0x67a   :  { %v621_v25 = vsel %vm133_vm0, %v619_v24, 0.0 }
 0x67b   :  { %v614_v26 = vpop.xlane.xlu2 %613  ;;  %622 = vadd.xlane.f32.xlu1 %v621_v25 }
 0x67c   :  { %v616_v39 = vmul.f32 %v614_v26, %v1904_v10  ;;  %v1585_v26 = vld [vmem:[#allocation8 + $0x9] ss:$0 sm:$0xff] }
 0x67e   :  { %v618_v2 = vsub.f32 %v2134_v37, %v616_v39 }
 0x680   :  { %v620_v63 = vmul.f32 %v618_v2, %v618_v2 }
 0x682   :  { %v624_v4 = vsel %vm133_vm0, %v620_v63, 0.0 }
 0x683   :  { %625 = vadd.xlane.f32.xlu0 %v624_v4  ;;  %v2168_v49 = vpop.permute.xlu2 %792 }
 0x684   :  { %1425 = vmatpush.xpose.msk.msrb.mxu0 %vm269_vm8, %v2168_v49 }
 0x68b   :  { %v2182_v9 = vpop.permute.xlu2 %786 }
 0x694   :  { %790 = vrot.lane.b32.xlu1 %v2150_v47, %s1834_s20 }
 0x697   :  { %788 = vrot.lane.b32.xlu0 %v2152_v48, %s1834_s20 }
 0x69c   :  { %782 = vrot.lane.b32.xlu1 %v2152_v48, %s1833_s4 }
 0x69f   :  { %784 = vrot.lane.b32.xlu0 %v2150_v47, %s1833_s4 }
 0x6a4   :  { %776 = vrot.lane.b32.xlu1 %v2152_v48, %s1835_s21 }
 0x6a7   :  { %778 = vrot.lane.b32.xlu0 %v2150_v47, %s1835_s21 }
 0x6ee   :  { %v623_v51 = vpop.xlane.xlu1 %622 }
 0x6ef   :  { %v627_v53 = vmul.f32 %v623_v51, %v1904_v10  ;;  %v127_v51 = vld [vmem:[#allocation10 + $0x28] sm:$0xff] }
 0x6f1   :  { %v629_v52 = vadd.f32 1e-05, %v627_v53  ;;  %v125_v53 = vld [vmem:[#allocation10 + $0x8] sm:$0xff] }
 0x6f3   :  { %1629 = vrsqrt.f32 %v629_v52  ;;  %vm637_vm13 = vweird.f32 %v629_v52 }
 0x6f6   :  { %v626_v56 = vpop.xlane.xlu0 %625 }
 0x6f7   :  { %v628_v5 = vmul.f32 %v626_v56, %v1904_v10  ;;  %v131_v56 = vld [vmem:[#allocation10 + $0x68] sm:$0xff] }
 0x6f9   :  { %v1630_v61 = vpop.eup %1629  ;;  %v630_v38 = vadd.f32 1e-05, %v628_v5 }
 0x6fa   :  { %v632_v62 = vmul.f32 %v1630_v61, %v629_v52  ;;  %vm638_vm12 = vweird.f32 %v1630_v61 }
 0x6fb   :  { %1631 = vrsqrt.f32 %v630_v38  ;;  %vm639_vm14 = vmor %vm637_vm13, %vm638_vm12  ;;  %vm647_vm1 = vweird.f32 %v630_v38 }
 0x6fc   :  { %v633_v6 = vmul.f32 %v1630_v61, %v632_v62 }
 0x6fe   :  { %v634_v55 = vmul.f32 0.5, %v633_v6  ;;  %v132_v6 = vld [vmem:[#allocation10 + $0x78] sm:$0xff] }
 0x700   :  { %v635_v7 = vsub.f32 1.5, %v634_v55 }
 0x701   :  { %v1632_v8 = vpop.eup %1631 }
 0x702   :  { %v636_v11 = vmul.f32 %v1630_v61, %v635_v7  ;;  %v642_v12 = vmul.f32 %v1632_v8, %v630_v38  ;;  %vm648_vm15 = vweird.f32 %v1632_v8 }
 0x703   :  { %vm649_vm2 = vmor %vm647_vm1, %vm648_vm15 }
 0x704   :  { %v640_v3 = vsel %vm639_vm14, %v1630_v61, %v636_v11  ;;  %v643_v57 = vmul.f32 %v1632_v8, %v642_v12 }
 0x705   :  { %v651_v59 = vmul.f32 %v640_v3, %v617_v0  ;;  %v2202_v0 = vpop.permute.xlu2 %780 }
 0x706   :  { %v644_v16 = vmul.f32 0.5, %v643_v57  ;;  %v2174_v17 = vpop.permute.xlu1 %790 }
 0x707   :  { %v1518_v18 = vpack.i.bf16 %v2174_v17, %v2168_v49  ;;  %1426 = vmatpush.xpose.msk.msrb.mxu0 %vm269_vm8, %v2174_v17  ;;  %v654_v19 = vmul.f32 %v1583_v14, %v651_v59 }
 0x708   :  { %v645_v20 = vsub.f32 1.5, %v644_v16 }
 0x709   :  { %v2180_v29 = vpop.permute.xlu0 %788  ;;  %v657_v30 = vadd.f32 %v1584_v15, %v654_v19 }
 0x70a   :  { %v646_v31 = vmul.f32 %v1632_v8, %v645_v20  ;;  %v1523_v33 = vpack.i.bf16 %v2182_v9, %v2180_v29 }
 0x70b   :  { %1420 = vmatmul.msk.f32.vlgmr.msra.gmra.mxu0 %vm133_vm0, %v657_v30 }
 0x70c   :  { %v650_v27 = vsel %vm649_vm2, %v1632_v8, %v646_v31  ;;  %1427 = vmatpush.xpose.msk.msrb.mxu0 %vm269_vm8, %v2180_v29 }
 0x70d   :  { %v652_v34 = vmul.f32 %v650_v27, %v618_v2 }
 0x70e   :  { %v2191_v41 = vpop.permute.xlu1 %782 }
 0x70f   :  { %v655_v35 = vmul.f32 %v1583_v14, %v652_v34 }
 0x710   :  { %1428 = vmatpush.xpose.msk.msrb.mxu0 %vm269_vm8, %v2182_v9 }
 0x711   :  { %v2193_v21 = vpop.permute.xlu0 %784  ;;  %v658_v22 = vadd.f32 %v1584_v15, %v655_v35 }
 0x712   :  { %v1528_v23 = vpack.i.bf16 %v2191_v41, %v2193_v21 }
 0x713   :  { %1421 = vmatmul.msk.f32.gmra.mxu0 %vm133_vm0, %v658_v22 }
 0x714   :  { %1429 = vmatpush.xpose.msk.msrb.mxu0 %vm269_vm8, %v2193_v21 }
 0x716   :  { %v2210_v25 = vpop.permute.xlu1 %776 }
 0x717   :  { %v1538_v27 = vpack.i.bf16 %v2144_v46, %v2210_v25 }
 0x718   :  { %1430 = vmatpush.xpose.msk.msrb.mxu0 %vm269_vm8, %v2191_v41 }
 0x719   :  { %v2206_v24 = vpop.permute.xlu0 %778 }
 0x71a   :  { %v1533_v31 = vpack.i.bf16 %v2206_v24, %v2202_v0 }
 0x71c   :  { %1431 = vmatpush.xpose.msk.msrb.mxu0 %vm269_vm8, %v2202_v0 }
 0x720   :  { %1432 = vmatpush.xpose.msk.msrb.mxu0 %vm269_vm8, %v2206_v24 }
 0x724   :  { %1433 = vmatpush.xpose.msk.msrb.mxu0 %vm269_vm8, %v2210_v25 }
 0x728   :  { %1434 = vmatpush.xpose.msk.msrb.mxu0 %vm269_vm8, %v2144_v46 }
 0x72c   :  { %1435 = vmatpush.xpose.msk.msrb.mxu0 %vm269_vm8, %v2150_v47 }
 0x730   :  { %1436 = vmatpush.xpose.msk.msrb.mxu0 %vm269_vm8, %v2152_v48 }
 0x788   :  { %v687_v39 = vpop.f32.mrf.mxu0 }
 0x789   :  { %v688_v42 = vadd.f32 %v1585_v26, %v687_v39 }
 0x78b   :  { %753 = vrot.lane.b32.xlu1 %v688_v42, %s1833_s4  ;;  %747 = vrot.lane.b32.xlu2 %v688_v42, %s1835_s21  ;;  %v765_v2 = vmul.f32 0.35355338, %v688_v42 }
 0x78d   :  { %1437 = vmatmul.msk.f32.vlgmr.msrb.gmra.mxu0 %vm269_vm8, %v765_v2 }
 0x790   :  { %v690_v63 = vpop.f32.mrf.mxu0 }
 0x791   :  { %v691_v4 = vadd.f32 %v1585_v26, %v690_v63 }
 0x793   :  { %761 = vrot.lane.b32.xlu1 %v691_v4, %s1834_s20  ;;  %755 = vrot.lane.b32.xlu2 %v691_v4, %s1833_s4  ;;  %v766_v43 = vmul.f32 0.35355338, %v691_v4 }
 0x794   :  { %749 = vrot.lane.b32.xlu0 %v691_v4, %s1835_s21 }
 0x795   :  { %1438 = vmatmul.msk.f32.gmra.mxu0 %vm269_vm8, %v766_v43 }
 0x79b   :  { %814 = vrot.lane.b32.xlu1 %v2006_v32, %s1837_s23  ;;  %810 = vrot.lane.b32.xlu2 %v2002_v28, %s1837_s23  ;;  %v128_v28 = vld [vmem:[#allocation10 + $0x38] sm:$0xff]  ;;  %v129_v32 = vld [vmem:[#allocation10 + $0x48] sm:$0xff] }
 0x79c   :  { %759 = vrot.lane.b32.xlu0 %v688_v42, %s1834_s20 }
 0x7a3   :  { %816 = vrot.lane.b32.xlu2 %v126_v45, %s1837_s23  ;;  %820 = vrot.lane.b32.xlu1 %v127_v51, %s1837_s23 }
 0x7a4   :  { %812 = vrot.lane.b32.xlu0 %v125_v53, %s1837_s23 }
 0x7ab   :  { %826 = vrot.lane.b32.xlu1 %v2021_v44, %s1837_s23  ;;  %822 = vrot.lane.b32.xlu2 %v2017_v40, %s1837_s23  ;;  %v130_v40 = vld [vmem:[#allocation10 + $0x58] sm:$0xff] }
 0x7ac   :  { %818 = vrot.lane.b32.xlu0 %v2010_v36, %s1837_s23 }
 0x7b3   :  { %828 = vrot.lane.b32.xlu2 %v129_v32, %s1837_s23  ;;  %832 = vrot.lane.b32.xlu1 %v130_v40, %s1837_s23 }
 0x7b4   :  { %824 = vrot.lane.b32.xlu0 %v128_v28, %s1837_s23 }
 0x7bb   :  { %836 = vrot.lane.b32.xlu1 %v131_v56, %s1837_s23 }
 0x7bc   :  { %830 = vrot.lane.b32.xlu0 %v2036_v54, %s1837_s23 }
 0x7c3   :  { %838 = vrot.lane.b32.xlu1 %v2043_v58, %s1837_s23 }
 0x7c4   :  { %834 = vrot.lane.b32.xlu0 %v2028_v50, %s1837_s23 }
 0x7cb   :  { %840 = vrot.lane.b32.xlu1 %v132_v6, %s1837_s23 }
 0x7e5   :  { %v748_v52 = vpop.permute.xlu2 %747 }
 0x7e6   :  { %v767_v44 = vmul.f32 0.35355338, %v748_v52 }
 0x7e8   :  { %1439 = vmatmul.msk.f32.gmra.mxu0 %vm269_vm8, %v767_v44 }
 0x7ed   :  { %v756_v36 = vpop.permute.xlu2 %755 }
 0x7ee   :  { %v770_v59 = vmul.f32 0.35355338, %v756_v36 }
 0x7f5   :  { %v811_v61 = vpop.permute.xlu2 %810 }
 0x7fd   :  { %v754_v5 = vpop.permute.xlu1 %753  ;;  %v817_v7 = vpop.permute.xlu2 %816 }
 0x7fe   :  { %v769_v11 = vmul.f32 0.35355338, %v754_v5 }
 0x805   :  { %v762_v50 = vpop.permute.xlu1 %761  ;;  %v823_v41 = vpop.permute.xlu2 %822 }
 0x806   :  { %v750_v54 = vpop.permute.xlu0 %749  ;;  %v772_v30 = vmul.f32 0.35355338, %v762_v50 }
 0x807   :  { %v768_v38 = vmul.f32 0.35355338, %v750_v54 }
 0x809   :  { %1440 = vmatmul.msk.f32.gmra.mxu0 %vm269_vm8, %v768_v38 }
 0x80a   :  { %v923_v62 = vpop.f32.mrf.mxu0 }
 0x80d   :  { %v815_v55 = vpop.permute.xlu1 %814  ;;  %v829_v46 = vpop.permute.xlu2 %828 }
 0x80e   :  { %v760_v8 = vpop.permute.xlu0 %759  ;;  %v843_v12 = vsel %vm351_vm9, %v815_v55, %v817_v7 }
 0x80f   :  { %v771_v20 = vmul.f32 0.35355338, %v760_v8 }
 0x811   :  { %1441 = vmatmul.msk.f32.gmra.mxu0 %vm269_vm8, %v769_v11 }
 0x812   :  { %v926_v14 = vpop.f32.mrf.mxu0 }
 0x813   :  { %v927_v58 = vadd.f32 %v926_v14, %v843_v12 }
 0x815   :  { %v951_v3 = vsel %vm947_vm3, %v927_v58, -inf  ;;  %v821_v17 = vpop.permute.xlu1 %820 }
 0x816   :  { %v813_v57 = vpop.permute.xlu0 %812  ;;  %952 = vmax.xlane.f32.xlu0 %v951_v3 }
 0x817   :  { %v842_v15 = vsel %vm351_vm9, %v811_v61, %v813_v57 }
 0x818   :  { %v924_v16 = vadd.f32 %v923_v62, %v842_v15 }
 0x819   :  { %1442 = vmatmul.msk.f32.gmra.mxu0 %vm269_vm8, %v770_v59 }
 0x81a   :  { %v948_v19 = vsel %vm947_vm3, %v924_v16, -inf }
 0x81b   :  { %949 = vmax.xlane.f32.xlu2 %v948_v19 }
 0x81d   :  { %v827_v21 = vpop.permute.xlu1 %826 }
 0x81e   :  { %v819_v49 = vpop.permute.xlu0 %818  ;;  %v846_v63 = vsel %vm351_vm9, %v827_v21, %v829_v46 }
 0x821   :  { %1443 = vmatmul.msk.f32.gmra.mxu0 %vm269_vm8, %v771_v20 }
 0x826   :  { %v825_v9 = vpop.permute.xlu0 %824 }
 0x827   :  { %v845_v0 = vsel %vm351_vm9, %v823_v41, %v825_v9 }
 0x829   :  { %1444 = vmatmul.msk.f32.gmra.mxu0 %vm269_vm8, %v772_v30 }
 0x82a   :  { %1519 = vrot.lane.b32.xlu0 %v1518_v18, %s1836_s22  ;;  %v844_v18 = vsel %vm351_vm9, %v819_v49, %v821_v17  ;;  %v1543_v17 = vpack.i.bf16 %v2152_v48, %v2150_v47 }
 0x832   :  { %1529 = vrot.lane.b32.xlu0 %v1528_v23, %s1836_s22  ;;  %v833_v23 = vpop.permute.xlu1 %832 }
 0x833   :  { %1524 = vrot.lane.b32.xlu2 %v1523_v33, %s1836_s22  ;;  %v831_v33 = vpop.permute.xlu0 %830 }
 0x834   :  { %v847_v40 = vsel %vm351_vm9, %v831_v33, %v833_v23 }
 0x83a   :  { %1534 = vrot.lane.b32.xlu0 %v1533_v31, %s1836_s22  ;;  %v837_v45 = vpop.permute.xlu1 %836 }
 0x83b   :  { %v835_v22 = vpop.permute.xlu0 %834 }
 0x83c   :  { %v848_v55 = vsel %vm351_vm9, %v835_v22, %v837_v45 }
 0x842   :  { %1539 = vrot.lane.b32.xlu0 %v1538_v27, %s1836_s22  ;;  %v839_v61 = vpop.permute.xlu1 %838 }
 0x84a   :  { %v841_v3 = vpop.permute.xlu1 %840 }
 0x84b   :  { %v849_v15 = vsel %vm351_vm9, %v839_v61, %v841_v3 }
 0x865   :  { %v929_v34 = vpop.f32.mrf.mxu0 }
 0x866   :  { %v2281_v35 = vadd.f32 %v929_v34, %v844_v18 }
 0x868   :  { %v954_v29 = vsel %vm947_vm3, %v2281_v35, -inf }
 0x869   :  { %955 = vmax.xlane.f32.xlu1 %v954_v29 }
 0x886   :  { %v932_v24 = vpop.f32.mrf.mxu0 }
 0x887   :  { %v2286_v25 = vadd.f32 %v932_v24, %v845_v0 }
 0x889   :  { %v957_v26 = vsel %vm947_vm3, %v2286_v25, -inf  ;;  %v953_v39 = vpop.xlane.xlu0 %952 }
 0x88a   :  { %958 = vmax.xlane.f32.xlu2 %v957_v26  ;;  %v973_v42 = vsub.f32 %v927_v58, %v953_v39 }
 0x88c   :  { %v982_v2 = vmul.f32 1.442695, %v973_v42 }
 0x88e   :  { %1633 = vpow2.f32 %v982_v2  ;;  %v935_v4 = vpop.f32.mrf.mxu0  ;;  %v950_v43 = vpop.xlane.xlu2 %949 }
 0x88f   :  { %v2291_v51 = vadd.f32 %v935_v4, %v846_v63  ;;  %v972_v53 = vsub.f32 %v924_v16, %v950_v43 }
 0x891   :  { %v980_v28 = vmul.f32 1.442695, %v972_v53  ;;  %v960_v32 = vsel %vm947_vm3, %v2291_v51, -inf }
 0x892   :  { %961 = vmax.xlane.f32.xlu2 %v960_v32 }
 0x893   :  { %1635 = vpow2.f32 %v980_v28 }
 0x894   :  { %v2295_v52 = vpop.eup %1633 }
 0x895   :  { %v999_v44 = vsel %vm947_vm3, %v2295_v52, 0.0 }
 0x896   :  { %v938_v36 = vpop.f32.mrf.mxu0  ;;  %1000 = vadd.xlane.f32.xlu0 %v999_v44  ;;  %v1525_v6 = vpop.permute.xlu2 %1524 }
 0x897   :  { %v2300_v56 = vadd.f32 %v938_v36, %v847_v40  ;;  %v1526_v12 = vunpack.i.l.bf16 %v1525_v6  ;;  %v1527_v58 = vunpack.i.h.bf16 %v1525_v6 }
 0x899   :  { %v2302_v5 = vpop.eup %1635  ;;  %v963_v50 = vsel %vm947_vm3, %v2300_v56, -inf }
 0x89a   :  { %964 = vmax.xlane.f32.xlu2 %v963_v50  ;;  %v996_v54 = vsel %vm947_vm3, %v2302_v5, 0.0 }
 0x89b   :  { %997 = vadd.xlane.f32.xlu1 %v996_v54 }
 0x89c   :  { %v1520_v38 = vpop.permute.xlu0 %1519 }
 0x89d   :  { %v1521_v62 = vunpack.i.l.bf16 %v1520_v38  ;;  %v1522_v8 = vunpack.i.h.bf16 %v1520_v38 }
 0x89e   :  { %v941_v7 = vpop.f32.mrf.mxu0 }
 0x89f   :  { %v2309_v11 = vadd.f32 %v941_v7, %v848_v55  ;;  %1100 = vmatpush.msra.mxu3 %v1521_v62 }
 0x8a1   :  { %1101 = vmatpush.msra.mxu3 %v1522_v8  ;;  %v966_v14 = vsel %vm947_vm3, %v2309_v11, -inf }
 0x8a3   :  { %967 = vmax.xlane.f32.xlu1 %v966_v14  ;;  %1102 = vmatpush.msra.mxu3 %v1526_v12 }
 0x8a4   :  { %v1530_v57 = vpop.permute.xlu0 %1529 }
 0x8a5   :  { %v1531_v59 = vunpack.i.l.bf16 %v1530_v57  ;;  %1103 = vmatpush.msra.mxu3 %v1527_v58  ;;  %v1532_v19 = vunpack.i.h.bf16 %v1530_v57 }
 0x8a6   :  { %v944_v16 = vpop.f32.mrf.mxu0 }
 0x8a7   :  { %v2314_v20 = vadd.f32 %v944_v16, %v849_v15  ;;  %1104 = vmatpush.msra.mxu3 %v1531_v59 }
 0x8a9   :  { %1105 = vmatpush.msra.mxu3 %v1532_v19  ;;  %v969_v30 = vsel %vm947_vm3, %v2314_v20, -inf }
 0x8aa   :  { %1554 = vrot.lane.b32.xlu0 %v2109_v1, %s1838_s24 }
 0x8ab   :  { %970 = vmax.xlane.f32.xlu1 %v969_v30 }
 0x8ac   :  { %v1535_v31 = vpop.permute.xlu0 %1534 }
 0x8ad   :  { %v1536_v27 = vunpack.i.l.bf16 %v1535_v31  ;;  %v1537_v49 = vunpack.i.h.bf16 %v1535_v31 }
 0x8af   :  { %1106 = vmatpush.msra.mxu3 %v1536_v27 }
 0x8b1   :  { %1107 = vmatpush.msra.mxu3 %v1537_v49 }
 0x8b2   :  { %1544 = vrot.lane.b32.xlu2 %v1543_v17, %s1836_s22 }
 0x8b4   :  { %v1540_v18 = vpop.permute.xlu0 %1539 }
 0x8b5   :  { %v1541_v34 = vunpack.i.l.bf16 %v1540_v18  ;;  %v1542_v29 = vunpack.i.h.bf16 %v1540_v18 }
 0x8b7   :  { %1108 = vmatpush.msra.mxu3 %v1541_v34 }
 0x8b9   :  { %1109 = vmatpush.msra.mxu3 %v1542_v29 }
 0x8dc   :  { %v956_v9 = vpop.xlane.xlu1 %955 }
 0x8dd   :  { %v974_v33 = vsub.f32 %v2281_v35, %v956_v9 }
 0x8df   :  { %v984_v41 = vmul.f32 1.442695, %v974_v33 }
 0x8e1   :  { %1637 = vpow2.f32 %v984_v41 }
 0x8e7   :  { %v1638_v21 = vpop.eup %1637 }
 0x8e8   :  { %v1002_v22 = vsel %vm947_vm3, %v1638_v21, 0.0 }
 0x8e9   :  { %1003 = vadd.xlane.f32.xlu1 %v1002_v22 }
 0x8fd   :  { %v959_v23 = vpop.xlane.xlu2 %958 }
 0x8fe   :  { %v975_v47 = vsub.f32 %v2286_v25, %v959_v23 }
 0x900   :  { %v986_v48 = vmul.f32 1.442695, %v975_v47 }
 0x902   :  { %1639 = vpow2.f32 %v986_v48 }
 0x905   :  { %v962_v46 = vpop.xlane.xlu2 %961 }
 0x906   :  { %v976_v0 = vsub.f32 %v2291_v51, %v962_v46 }
 0x908   :  { %v1640_v24 = vpop.eup %1639  ;;  %v988_v26 = vmul.f32 1.442695, %v976_v0 }
 0x909   :  { %v1005_v39 = vsel %vm947_vm3, %v1640_v24, 0.0  ;;  %v1001_v43 = vpop.xlane.xlu0 %1000 }
 0x90a   :  { %1641 = vpow2.f32 %v988_v26  ;;  %1006 = vadd.xlane.f32.xlu2 %v1005_v39 }
 0x90d   :  { %v965_v35 = vpop.xlane.xlu2 %964 }
 0x90e   :  { %v977_v42 = vsub.f32 %v2300_v56, %v965_v35  ;;  %v998_v2 = vpop.xlane.xlu1 %997 }
 0x90f   :  { %1643 = vrcp.f32 %v998_v2 }
 0x910   :  { %v1642_v63 = vpop.eup %1641  ;;  %v990_v4 = vmul.f32 1.442695, %v977_v42 }
 0x911   :  { %v1008_v25 = vsel %vm947_vm3, %v1642_v63, 0.0 }
 0x912   :  { %1645 = vpow2.f32 %v990_v4  ;;  %1009 = vadd.xlane.f32.xlu1 %v1008_v25 }
 0x913   :  { %1647 = vrcp.f32 %v1001_v43 }
 0x915   :  { %v1545_v45 = vpop.permute.xlu2 %1544  ;;  %v1644_v51 = vpop.eup %1643 }
 0x916   :  { %v1546_v53 = vunpack.i.l.bf16 %v1545_v45  ;;  %v968_v28 = vpop.xlane.xlu1 %967  ;;  %v1547_v40 = vunpack.i.h.bf16 %v1545_v45  ;;  %v1028_v36 = vmul.f32 %v1644_v51, %v2302_v5 }
 0x917   :  { %v978_v32 = vsub.f32 %v2309_v11, %v968_v28 }
 0x918   :  { %v1646_v44 = vpop.eup %1645  ;;  %1110 = vmatpush.msra.mxu3 %v1546_v53  ;;  %v1586_v53 = vld [vmem:[#allocation8 + $0xb] ss:$0 sm:$0xff] }
 0x919   :  { %v992_v56 = vmul.f32 1.442695, %v978_v32  ;;  %v1011_v61 = vsel %vm947_vm3, %v1646_v44, 0.0  ;;  %v1648_v50 = vpop.eup %1647 }
 0x91a   :  { %1012 = vadd.xlane.f32.xlu1 %v1011_v61  ;;  %1111 = vmatpush.msra.mxu3 %v1547_v40  ;;  %v1029_v55 = vmul.f32 %v1648_v50, %v2295_v52 }
 0x91b   :  { %1649 = vpow2.f32 %v992_v56  ;;  %1445 = vmatmul.msk.f32.vlgmr.msra.gmra.mxu3 %vm947_vm3, %v1028_v36 }
 0x91c   :  { %v1555_v48 = vpop.permute.xlu0 %1554 }
 0x91d   :  { %v1556_v46 = vunpack.i.l.bf16 %v1555_v48  ;;  %v1557_v0 = vunpack.i.h.bf16 %v1555_v48 }
 0x91e   :  { %v971_v54 = vpop.xlane.xlu1 %970 }
 0x91f   :  { %v979_v38 = vsub.f32 %v2314_v20, %v971_v54  ;;  %v1264_v54 = vld [vmem:[#allocation7 + $0x58] sm:$0xff] }
 0x920   :  { %1284 = vmatpush.msra.mxu1 %v1264_v54 }
 0x921   :  { %v1650_v62 = vpop.eup %1649  ;;  %v994_v6 = vmul.f32 1.442695, %v979_v38  ;;  %v1263_v38 = vld [vmem:[#allocation7 + $0x40] sm:$0xff] }
 0x922   :  { %v1014_v7 = vsel %vm947_vm3, %v1650_v62, 0.0  ;;  %1285 = vmatpush.msra.mxu1 %v1263_v38 }
 0x923   :  { %1651 = vpow2.f32 %v994_v6  ;;  %1015 = vadd.xlane.f32.xlu1 %v1014_v7  ;;  %1446 = vmatmul.msk.f32.gmra.mxu3 %vm947_vm3, %v1029_v55 }
 0x929   :  { %v1652_v5 = vpop.eup %1651 }
 0x92a   :  { %v1017_v8 = vsel %vm947_vm3, %v1652_v5, 0.0 }
 0x92b   :  { %1018 = vadd.xlane.f32.xlu1 %v1017_v8 }
 0x944   :  { %1549 = vrot.lane.b32.xlu1 %v2111_v60, %s1838_s24 }
 0x95c   :  { %v1004_v11 = vpop.xlane.xlu1 %1003 }
 0x95d   :  { %1653 = vrcp.f32 %v1004_v11 }
 0x963   :  { %v1654_v12 = vpop.eup %1653 }
 0x964   :  { %v1030_v14 = vmul.f32 %v1654_v12, %v1638_v21 }
 0x966   :  { %1447 = vmatmul.msk.f32.gmra.mxu3 %vm947_vm3, %v1030_v14 }
 0x97d   :  { %v1007_v58 = vpop.xlane.xlu2 %1006 }
 0x97e   :  { %1655 = vrcp.f32 %v1007_v58  ;;  %v1303_v58 = vld [vmem:[#allocation7 + $0xa0] sm:$0xff] }
 0x984   :  { %v1656_v3 = vpop.eup %1655 }
 0x985   :  { %v1010_v52 = vpop.xlane.xlu1 %1009  ;;  %v1031_v57 = vmul.f32 %v1656_v3, %v1640_v24  ;;  %v1304_v3 = vld [vmem:[#allocation7 + $0xb8] sm:$0xff] }
 0x986   :  { %1657 = vrcp.f32 %v1010_v52  ;;  %v1558_v52 = vpack.i.bf16 %v1303_v58, %v1304_v3 }
 0x987   :  { %1448 = vmatmul.msk.f32.gmra.mxu3 %vm947_vm3, %v1031_v57  ;;  %v1261_v57 = vld [vmem:[#allocation7 + $0x10] sm:$0xff] }
 0x98c   :  { %v1658_v59 = vpop.eup %1657 }
 0x98d   :  { %v1013_v15 = vpop.xlane.xlu1 %1012  ;;  %v1032_v16 = vmul.f32 %v1658_v59, %v1642_v63  ;;  %v1568_v59 = vpack.i.bf16 %v1263_v38, %v1264_v54  ;;  %v1589_v54 = vld [vmem:[#allocation8 + $0x2] ss:$0 sm:$0xff] }
 0x98e   :  { %1659 = vrcp.f32 %v1013_v15 }
 0x98f   :  { %1449 = vmatmul.msk.f32.gmra.mxu3 %vm947_vm3, %v1032_v16 }
 0x994   :  { %v1660_v19 = vpop.eup %1659 }
 0x995   :  { %v1033_v20 = vmul.f32 %v1660_v19, %v1646_v44 }
 0x996   :  { %v1016_v30 = vpop.xlane.xlu1 %1015 }
 0x997   :  { %1661 = vrcp.f32 %v1016_v30  ;;  %1450 = vmatmul.msk.f32.gmra.mxu3 %vm947_vm3, %v1033_v20  ;;  %v1301_v30 = vld [vmem:[#allocation7 + $0x70] sm:$0xff] }
 0x99d   :  { %v1662_v31 = vpop.eup %1661 }
 0x99e   :  { %v1019_v27 = vpop.xlane.xlu1 %1018  ;;  %v1034_v49 = vmul.f32 %v1662_v31, %v1650_v62  ;;  %v1113_v18 = vpop.f32.mrf.mxu3  ;;  %v1262_v62 = vld [vmem:[#allocation7 + $0x28] sm:$0xff] }
 0x99f   :  { %1663 = vrcp.f32 %v1019_v27  ;;  %1286 = vmatpush.msra.mxu1 %v1262_v62  ;;  %v1573_v15 = vpack.i.bf16 %v1261_v57, %v1262_v62  ;;  %v1302_v31 = vld [vmem:[#allocation7 + $0x88] sm:$0xff] }
 0x9a0   :  { %1451 = vmatmul.msk.f32.gmra.mxu3 %vm947_vm3, %v1034_v49  ;;  %v1563_v27 = vpack.i.bf16 %v1301_v30, %v1302_v31 }
 0x9a1   :  { %1287 = vmatpush.msra.mxu1 %v1261_v57 }
 0x9a5   :  { %v1664_v17 = vpop.eup %1663 }
 0x9a6   :  { %v1035_v60 = vmul.f32 %v1664_v17, %v1652_v5  ;;  %v1116_v34 = vpop.f32.mrf.mxu3 }
 0x9a8   :  { %1452 = vmatmul.msk.f32.gmra.mxu3 %vm947_vm3, %v1035_v60 }
 0x9b6   :  { %v1550_v22 = vpop.permute.xlu1 %1549 }
 0x9b7   :  { %v1551_v23 = vunpack.i.l.bf16 %v1550_v22  ;;  %v1552_v1 = vunpack.i.h.bf16 %v1550_v22 }
 0x9b9   :  { %1198 = vmatpush.msrb.mxu2 %v1551_v23  ;;  %v1587_v23 = vld [vmem:[#allocation8 + $0x7] ss:$0 sm:$0xff] }
 0x9bb   :  { %1199 = vmatpush.msrb.mxu2 %v1552_v1 }
 0x9bd   :  { %1200 = vmatpush.msrb.mxu2 %v1556_v46  ;;  %v1588_v46 = vld [vmem:[#allocation8 + $0x8] ss:$0 sm:$0xff] }
 0x9bf   :  { %1201 = vmatpush.msrb.mxu2 %v1557_v0 }
 0x9e9   :  { %v1119_v29 = vpop.f32.mrf.mxu3 }
 0x9ea   :  { %1139 = vrot.lane.b32.xlu2 %v1119_v29, %s1823_s27 }
 0xa0a   :  { %v1122_v9 = vpop.f32.mrf.mxu3 }
 0xa0b   :  { %1141 = vrot.lane.b32.xlu2 %v1122_v9, %s1823_s27 }
 0xa12   :  { %v1125_v33 = vpop.f32.mrf.mxu3 }
 0xa13   :  { %1147 = vrot.lane.b32.xlu0 %v1125_v33, %s1831_s19 }
 0xa1a   :  { %v1128_v41 = vpop.f32.mrf.mxu3 }
 0xa1b   :  { %1149 = vrot.lane.b32.xlu0 %v1128_v41, %s1831_s19 }
 0xa23   :  { %v1131_v21 = vpop.f32.mrf.mxu3 }
 0xa24   :  { %1155 = vrot.lane.b32.xlu1 %v1131_v21, %s1828_s13 }
 0xa2b   :  { %v1134_v47 = vpop.f32.mrf.mxu3 }
 0xa2c   :  { %1157 = vrot.lane.b32.xlu1 %v1134_v47, %s1828_s13 }
 0xa44   :  { %v1140_v26 = vpop.permute.xlu2 %1139 }
 0xa45   :  { %v1161_v39 = vsel %vm269_vm8, %v1113_v18, %v1140_v26 }
 0xa65   :  { %v1142_v63 = vpop.permute.xlu2 %1141 }
 0xa66   :  { %v1162_v25 = vsel %vm269_vm8, %v1116_v34, %v1142_v63 }
 0xa85   :  { %v1148_v24 = vpop.permute.xlu0 %1147 }
 0xa86   :  { %v1163_v35 = vsel %vm555_vm10, %v1161_v39, %v1148_v24 }
 0xa8d   :  { %v1150_v4 = vpop.permute.xlu0 %1149 }
 0xa8e   :  { %v1164_v43 = vsel %vm555_vm10, %v1162_v25, %v1150_v4 }
 0xa96   :  { %v1156_v42 = vpop.permute.xlu1 %1155 }
 0xa97   :  { %v1165_v2 = vsel %vm558_vm11, %v1163_v35, %v1156_v42 }
 0xa98   :  { %1453 = vmatmul.msk.f32.vlgmr.msrb.gmra.mxu2 %vm133_vm0, %v1165_v2 }
 0xa9e   :  { %v1158_v45 = vpop.permute.xlu1 %1157 }
 0xa9f   :  { %v1166_v51 = vsel %vm558_vm11, %v1164_v43, %v1158_v45 }
 0xaa0   :  { %1454 = vmatmul.msk.f32.gmra.mxu2 %vm133_vm0, %v1166_v51 }
 0xb1b   :  { %v1203_v28 = vpop.f32.mrf.mxu2 }
 0xb1c   :  { %v1204_v32 = vadd.f32 %v1586_v53, %v1203_v28 }
 0xb1e   :  { %v2362_v44 = vadd.f32 %v1204_v32, %v2129_v13 }
 0xb20   :  { %v1211_v40 = vsel %vm133_vm0, %v2362_v44, 0.0 }
 0xb21   :  { %1212 = vadd.xlane.f32.xlu2 %v1211_v40 }
 0xb23   :  { %v1206_v36 = vpop.f32.mrf.mxu2 }
 0xb24   :  { %v1207_v56 = vadd.f32 %v1586_v53, %v1206_v36 }
 0xb26   :  { %v2367_v61 = vadd.f32 %v1207_v56, %v2134_v37 }
 0xb28   :  { %v1214_v50 = vsel %vm133_vm0, %v2367_v61, 0.0 }
 0xb29   :  { %1215 = vadd.xlane.f32.xlu0 %v1214_v50 }
 0xb3d   :  { %1559 = vrot.lane.b32.xlu0 %v1558_v52, %s1837_s23 }
 0xb45   :  { %1574 = vrot.lane.b32.xlu0 %v1573_v15, %s1837_s23 }
 0xb94   :  { %v1213_v13 = vpop.xlane.xlu2 %1212 }
 0xb95   :  { %v1217_v6 = vmul.f32 %v1213_v13, %v1904_v10 }
 0xb97   :  { %v1219_v55 = vsub.f32 %v2362_v44, %v1217_v6 }
 0xb99   :  { %v1221_v7 = vmul.f32 %v1219_v55, %v1219_v55 }
 0xb9b   :  { %v1223_v5 = vsel %vm133_vm0, %v1221_v7, 0.0 }
 0xb9c   :  { %1224 = vadd.xlane.f32.xlu1 %v1223_v5  ;;  %v1216_v37 = vpop.xlane.xlu0 %1215  ;;  %v1590_v5 = vld [vmem:[#allocation8 + $0xc] ss:$0 sm:$0xff] }
 0xb9d   :  { %v1218_v8 = vmul.f32 %v1216_v37, %v1904_v10 }
 0xb9f   :  { %v1220_v11 = vsub.f32 %v2367_v61, %v1218_v8 }
 0xba1   :  { %v1222_v12 = vmul.f32 %v1220_v11, %v1220_v11 }
 0xba3   :  { %v1226_v14 = vsel %vm133_vm0, %v1222_v12, 0.0 }
 0xba4   :  { %1227 = vadd.xlane.f32.xlu2 %v1226_v14 }
 0xbaf   :  { %v1560_v4 = vpop.permute.xlu0 %1559 }
 0xbb0   :  { %v1562_v43 = vunpack.i.h.bf16 %v1560_v4  ;;  %v1561_v45 = vunpack.i.l.bf16 %v1560_v4 }
 0xbb2   :  { %1352 = vmatpush.msra.mxu2 %v1561_v45 }
 0xbb4   :  { %1353 = vmatpush.msra.mxu2 %v1562_v43 }
 0xbb5   :  { %1569 = vrot.lane.b32.xlu1 %v1568_v59, %s1837_s23 }
 0xbb7   :  { %v1575_v40 = vpop.permute.xlu0 %1574 }
 0xbb8   :  { %v1576_v56 = vunpack.i.l.bf16 %v1575_v40  ;;  %v1577_v50 = vunpack.i.h.bf16 %v1575_v40 }
 0xbbc   :  { %1564 = vrot.lane.b32.xlu2 %v1563_v27, %s1837_s23 }
 0xc0f   :  { %v1225_v16 = vpop.xlane.xlu1 %1224 }
 0xc10   :  { %v1229_v19 = vmul.f32 %v1225_v16, %v1904_v10 }
 0xc12   :  { %v1231_v20 = vadd.f32 1e-05, %v1229_v19 }
 0xc14   :  { %1665 = vrsqrt.f32 %v1231_v20  ;;  %vm1239_vm5 = vweird.f32 %v1231_v20 }
 0xc17   :  { %v1228_v49 = vpop.xlane.xlu2 %1227 }
 0xc18   :  { %v1230_v17 = vmul.f32 %v1228_v49, %v1904_v10 }
 0xc1a   :  { %v1666_v60 = vpop.eup %1665  ;;  %v1232_v18 = vadd.f32 1e-05, %v1230_v17 }
 0xc1b   :  { %v1234_v34 = vmul.f32 %v1666_v60, %v1231_v20  ;;  %vm1240_vm4 = vweird.f32 %v1666_v60 }
 0xc1c   :  { %1667 = vrsqrt.f32 %v1232_v18  ;;  %vm1241_vm6 = vmor %vm1239_vm5, %vm1240_vm4  ;;  %vm1249_vm8 = vweird.f32 %v1232_v18 }
 0xc1d   :  { %v1235_v29 = vmul.f32 %v1666_v60, %v1234_v34 }
 0xc1f   :  { %v1236_v9 = vmul.f32 0.5, %v1235_v29  ;;  %v1565_v25 = vpop.permute.xlu2 %1564 }
 0xc20   :  { %v1566_v51 = vunpack.i.l.bf16 %v1565_v25  ;;  %v1567_v53 = vunpack.i.h.bf16 %v1565_v25 }
 0xc21   :  { %v1237_v33 = vsub.f32 1.5, %v1236_v9 }
 0xc22   :  { %v1668_v41 = vpop.eup %1667  ;;  %1354 = vmatpush.msra.mxu2 %v1566_v51 }
 0xc23   :  { %v1238_v21 = vmul.f32 %v1666_v60, %v1237_v33  ;;  %v1244_v22 = vmul.f32 %v1668_v41, %v1232_v18  ;;  %vm1250_vm7 = vweird.f32 %v1668_v41 }
 0xc24   :  { %vm1251_vm10 = vmor %vm1249_vm8, %vm1250_vm7  ;;  %1355 = vmatpush.msra.mxu2 %v1567_v53 }
 0xc25   :  { %v1242_v1 = vsel %vm1241_vm6, %v1666_v60, %v1238_v21  ;;  %v1245_v47 = vmul.f32 %v1668_v41, %v1244_v22 }
 0xc26   :  { %v1253_v48 = vmul.f32 %v1242_v1, %v1219_v55 }
 0xc27   :  { %v1246_v0 = vmul.f32 0.5, %v1245_v47  ;;  %v1570_v28 = vpop.permute.xlu1 %1569 }
 0xc28   :  { %v1256_v10 = vmul.f32 %v1587_v23, %v1253_v48  ;;  %v1571_v32 = vunpack.i.l.bf16 %v1570_v28  ;;  %v1572_v36 = vunpack.i.h.bf16 %v1570_v28 }
 0xc29   :  { %v1247_v24 = vsub.f32 1.5, %v1246_v0 }
 0xc2a   :  { %v1259_v26 = vadd.f32 %v1588_v46, %v1256_v10  ;;  %1356 = vmatpush.msra.mxu2 %v1571_v32 }
 0xc2b   :  { %v1248_v39 = vmul.f32 %v1668_v41, %v1247_v24 }
 0xc2c   :  { %1455 = vmatmul.msk.f32.vlgmr.msra.gmra.mxu1 %vm133_vm0, %v1259_v26  ;;  %1357 = vmatpush.msra.mxu2 %v1572_v36 }
 0xc2d   :  { %v1252_v35 = vsel %vm1251_vm10, %v1668_v41, %v1248_v39 }
 0xc2e   :  { %v1254_v42 = vmul.f32 %v1252_v35, %v1220_v11  ;;  %1358 = vmatpush.msra.mxu2 %v1576_v56 }
 0xc30   :  { %v1257_v2 = vmul.f32 %v1587_v23, %v1254_v42  ;;  %1359 = vmatpush.msra.mxu2 %v1577_v50 }
 0xc32   :  { %v1260_v63 = vadd.f32 %v1588_v46, %v1257_v2 }
 0xc34   :  { %1456 = vmatmul.msk.f32.gmra.mxu1 %vm133_vm0, %v1260_v63 }
 0xca9   :  { %v1289_v38 = vpop.f32.mrf.mxu1 }
 0xcaa   :  { %v1290_v62 = vadd.f32 %v1589_v54, %v1289_v38 }
 0xcac   :  { %v1295_v13 = vmax.f32 %v1290_v62, 0.0 }
 0xcae   :  { %1457 = vmatmul.msk.f32.vlgmr.msra.gmra.mxu2 %vm351_vm9, %v1295_v13 }
 0xcb1   :  { %v1292_v6 = vpop.f32.mrf.mxu1 }
 0xcb2   :  { %v1293_v55 = vadd.f32 %v1589_v54, %v1292_v6 }
 0xcb4   :  { %v1296_v7 = vmax.f32 %v1293_v55, 0.0 }
 0xcb6   :  { %1458 = vmatmul.msk.f32.gmra.mxu2 %vm351_vm9, %v1296_v7 }
 0xd31   :  { %v1361_v37 = vpop.f32.mrf.mxu2 }
 0xd32   :  { %v1362_v8 = vadd.f32 %v1590_v5, %v1361_v37 }
 0xd34   :  { %v1367_v11 = vadd.f32 %v1362_v8, %v2362_v44 }
 0xd36   :  { %1369 = vst.msk [vmem:[#allocation11] sm:$0xff] %vm133_vm0, %v1367_v11 }
 0xd39   :  { %v1364_v12 = vpop.f32.mrf.mxu2 }
 0xd3a   :  { %v1365_v14 = vadd.f32 %v1590_v5, %v1364_v12 }
 0xd3c   :  { %v1368_v58 = vadd.f32 %v1365_v14, %v2367_v61 }
 0xd3e   :  { %1370 = vst.msk [vmem:[#allocation11 + $0x8] sm:$0xff] %vm133_vm0, %v1368_v58 }
 0xd3f   :  { %1383 = dma.vmem_to_hbm [thread:$0]  %s1376_s28, 256, %s1378_s6, [#allocation4], %s1822_s26, %s1822_s26, %s1823_s27  }
 0xd40   :  { %1819 = dma.done.wait [#allocation4], 256  }
 0xd41   :  { %1820 = vsyncadd [#allocation4], 4294967040 }
 0xd42   :  { %1388 = vsyncpa [#allocation3], 1 }
 0xd43   :  { %1389 = vsyncpa [#allocation6], 1 }
 0xd44   :  { %1390 = vsyncpa [#allocation9], 1 }
 0xd45   :  { %1391 = vsyncpa [#allocation4], 1 }

</bundles_post_ra>
